<compile_context>
chip_gen: v5e
topology: v5e:2x2
jax: 0.10.0
libtpu: 0.0.40
codegen_flags: <defaults>
</compile_context>

<pallas_src>
import numpy as np
import jax
import jax.numpy as jnp
from jax import lax
from jax.experimental import pallas as pl
from jax.experimental.pallas import tpu as pltpu


CHUNK = 8   # sublane-aligned row group for the recurrence / hs stores


def lstm_tagger_kernel(sent_ref,   # SMEM (Tp,)       token ids (padded)
                       emb_ref,    # ANY  (V, E)      embedding table (HBM)
                       wih_ref,    # VMEM (E, 4H)     input->gates  (i,f,o,g)
                       whh_ref,    # VMEM (H, 4H)     hidden->gates (i,f,o,g)
                       b_ref,      # VMEM (1, 4H)     b_ih + b_hh   (i,f,o,g)
                       wout_ref,   # VMEM (H, TagP)   hidden2tag weight (padded)
                       bout_ref,   # VMEM (1, TagP)   hidden2tag bias (padded)
                       out_ref,    # VMEM (Tp, TagP)  log-softmax scores
                       x_ref,      # VMEM (Tp, E)     gathered embedding rows
                       xp_ref,     # VMEM (CHUNK, 4H) per-chunk input projection
                       hs_ref,     # VMEM (Tp, H)     per-step hidden states
                       sem):       # DMA sems (Tp,)   one per gathered row
    Tp = x_ref.shape[0]
    H = whh_ref.shape[0]
    n_chunks = Tp // CHUNK

    # ---- In-kernel embedding gather: issue every row DMA up front. --------
    @pl.loop(0, Tp)
    def _(t):
        row = sent_ref[t]
        pltpu.make_async_copy(emb_ref.at[pl.ds(row, 1)],
                              x_ref.at[pl.ds(t, 1)],
                              sem.at[t]).start()

    # Hoist weight / bias loads out of the recurrence.
    wih = wih_ref[...]
    whh = whh_ref[...]
    bias = b_ref[...]

    def chunk_body(k, carry):
        h, c = carry
        base = pl.multiple_of(k * CHUNK, CHUNK)

        # Wait only for this chunk's rows; later chunks' DMAs keep flying.
        for j in range(CHUNK):
            pltpu.make_async_copy(emb_ref.at[pl.ds(0, 1)],
                                  x_ref.at[pl.ds(base + j, 1)],
                                  sem.at[base + j]).wait()

        # Chunked input projection -> small VMEM scratch (bounds vreg
        # pressure; per-step gate rows come back through cheap vld slots).
        xp_ref[...] = (jnp.dot(x_ref[pl.ds(base, CHUNK), :], wih,
                               preferred_element_type=jnp.float32) + bias)

        # Static 8-step unroll: only the (1,H)@(H,4H) MXU matmul plus the
        # gate nonlinearities remain on the serial dependency chain.
        # TODO(synk): drive whh via pltpu.matmul_push_rhs/acc_lhs/pop if the
        # bundle dump shows the compiler re-pushing the weights every step.
        rows = []
        for j in range(CHUNK):
            gates = xp_ref[pl.ds(j, 1), :] + jnp.dot(
                h, whh, preferred_element_type=jnp.float32)       # (1, 4H)
            sig = jax.nn.sigmoid(gates[:, :3 * H])   # i | f | o (contiguous)
            g_g = jnp.tanh(gates[:, 3 * H:])         # g
            i_g = sig[:, 0 * H:1 * H]
            f_g = sig[:, 1 * H:2 * H]
            o_g = sig[:, 2 * H:3 * H]
            c = f_g * c + i_g * g_g
            h = o_g * jnp.tanh(c)
            rows.append(h)

        # One sublane-aligned (CHUNK, H) store instead of 8 masked row stores.
        hs_ref[pl.ds(base, CHUNK), :] = jnp.concatenate(rows, axis=0)
        return (h, c)

    h0 = jnp.zeros((1, H), jnp.float32)
    c0 = jnp.zeros((1, H), jnp.float32)
    lax.fori_loop(0, n_chunks, chunk_body, (h0, c0))

    # ---- Batched hidden2tag + log_softmax, one lane-dense store. ----------
    tag = (jnp.dot(hs_ref[...], wout_ref[...],
                   preferred_element_type=jnp.float32) + bout_ref[...])
    m = jnp.max(tag, axis=1, keepdims=True)
    logz = m + jnp.log(jnp.sum(jnp.exp(tag - m), axis=1, keepdims=True))
    out_ref[...] = tag - logz


def lstm_tagger_forward(sentence, emb, w_ih, w_hh, b_ih, b_hh, w_out, b_out):
    """sentence: (T,) int32; parameters in their PyTorch layouts."""
    T = sentence.shape[0]
    E = emb.shape[1]
    H = w_hh.shape[1]
    tagset = w_out.shape[0]

    Tp = ((T + CHUNK - 1) // CHUNK) * CHUNK
    TagP = ((tagset + 127) // 128) * 128

    # Gate-column permutation: PyTorch (i, f, g, o) -> (i, f, o, g) so the
    # sigmoid gates are contiguous in the kernel. Bias permuted identically.
    perm = jnp.concatenate([jnp.arange(0, H), jnp.arange(H, 2 * H),
                            jnp.arange(3 * H, 4 * H), jnp.arange(2 * H, 3 * H)])
    wih = w_ih.T[:, perm]                               # (E, 4H)
    whh = w_hh.T[:, perm]                               # (H, 4H)
    bias = (b_ih + b_hh)[perm][None, :]                 # (1, 4H)

    # Lane-dense output: pad tag dim to a multiple of 128. Padded columns get
    # weight 0 and bias -1e30 so the log_softmax over real columns is exact.
    wout_p = jnp.pad(w_out.T, ((0, 0), (0, TagP - tagset)))
    bout_p = jnp.pad(b_out[None, :], ((0, 0), (0, TagP - tagset)),
                     constant_values=-1e30)

    # Pad the sentence to a CHUNK multiple (token id 0; rows sliced away).
    sent_p = jnp.pad(sentence.astype(jnp.int32), (0, Tp - T))

    smem = pl.BlockSpec(memory_space=pltpu.MemorySpace.SMEM)
    hbm = pl.BlockSpec(memory_space=pl.ANY)
    vmem = pl.BlockSpec(memory_space=pltpu.MemorySpace.VMEM)

    out_pad = pl.pallas_call(
        lstm_tagger_kernel,
        out_shape=jax.ShapeDtypeStruct((Tp, TagP), jnp.float32),
        in_specs=[smem, hbm, vmem, vmem, vmem, vmem, vmem],
        out_specs=vmem,
        scratch_shapes=[pltpu.VMEM((Tp, E), jnp.float32),        # gathered x
                        pltpu.VMEM((CHUNK, 4 * H), jnp.float32),  # xproj chunk
                        pltpu.VMEM((Tp, H), jnp.float32),         # hidden rows
                        pltpu.SemaphoreType.DMA((Tp,))],
        compiler_params=pltpu.CompilerParams(
            vmem_limit_bytes=64 * 1024 * 1024),
    )(sent_p, emb, wih, whh, bias, wout_p, bout_p)
    return out_pad[:T, :tagset]


def reference_forward(sentence, emb, w_ih, w_hh, b_ih, b_hh, w_out, b_out):
    """Pure-JAX reference (same math as the PyTorch module, i,f,g,o order)."""
    H = w_hh.shape[1]
    x_seq = emb[sentence]                                # (T, E)

    def cell(carry, x):
        h, c = carry
        g = x @ w_ih.T + h @ w_hh.T + b_ih + b_hh        # (4H,)
        i = jax.nn.sigmoid(g[0:H])
        f = jax.nn.sigmoid(g[H:2 * H])
        gg = jnp.tanh(g[2 * H:3 * H])
        o = jax.nn.sigmoid(g[3 * H:4 * H])
        c = f * c + i * gg
        h = o * jnp.tanh(c)
        return (h, c), h

    h0 = jnp.zeros((H,), jnp.float32)
    (_, _), hs = lax.scan(cell, (h0, h0), x_seq)
    tag = hs @ w_out.T + b_out                           # (T, Tag)
    return jax.nn.log_softmax(tag, axis=1)


if __name__ == "__main__":
    # Small shapes consistent with the module (seq-first, batch=1).
    seq_len = 10          # deliberately not a CHUNK multiple (tests padding)
    embedding_dim = 32
    hidden_dim = 32
    vocab_size = 50
    tagset_size = 16

    key = jax.random.PRNGKey(0)
    ks = jax.random.split(key, 8)

    # Deterministic synthetic parameters in PyTorch layouts.
    emb = jax.random.normal(ks[0], (vocab_size, embedding_dim), jnp.float32) * 0.1
    w_ih = jax.random.normal(ks[1], (4 * hidden_dim, embedding_dim), jnp.float32) * 0.1
    w_hh = jax.random.normal(ks[2], (4 * hidden_dim, hidden_dim), jnp.float32) * 0.1
    b_ih = jax.random.normal(ks[3], (4 * hidden_dim,), jnp.float32) * 0.1
    b_hh = jax.random.normal(ks[4], (4 * hidden_dim,), jnp.float32) * 0.1
    w_out = jax.random.normal(ks[5], (tagset_size, hidden_dim), jnp.float32) * 0.1
    b_out = jax.random.normal(ks[6], (tagset_size,), jnp.float32) * 0.1

    sentence = jax.random.randint(ks[7], (seq_len,), 0, vocab_size, jnp.int32)

    out = lstm_tagger_forward(sentence, emb, w_ih, w_hh, b_ih, b_hh,
                              w_out, b_out)
    out = jax.block_until_ready(out)

    ref = reference_forward(sentence, emb, w_ih, w_hh, b_ih, b_hh,
                            w_out, b_out)
    np.testing.assert_allclose(np.asarray(out), np.asarray(ref),
                               rtol=1e-5, atol=1e-5)
    print("KERNEL_OK")
</pallas_src>

<mosaic_0001>
module attributes {stable_mosaic.version = 11 : i64} {
  func.func @lstm_tagger_kernel(%arg0: memref<16xi32, #tpu.memory_space<smem>>, %arg1: memref<50x32xf32, #tpu.memory_space<any>>, %arg2: memref<32x128xf32, #tpu.memory_space<vmem>>, %arg3: memref<32x128xf32, #tpu.memory_space<vmem>>, %arg4: memref<1x128xf32, #tpu.memory_space<vmem>>, %arg5: memref<32x128xf32, #tpu.memory_space<vmem>>, %arg6: memref<1x128xf32, #tpu.memory_space<vmem>>, %arg7: memref<16x128xf32, #tpu.memory_space<vmem>>, %arg8: memref<16x32xf32, #tpu.memory_space<vmem>>, %arg9: memref<8x128xf32, #tpu.memory_space<vmem>>, %arg10: memref<16x32xf32, #tpu.memory_space<vmem>>, %arg11: memref<16x!tpu.dma_semaphore, #tpu.memory_space<semaphore_mem>>) attributes {dimension_semantics = [], scalar_prefetch = 0 : i64, scratch_operands = 4 : i64, tpu.core_type = #tpu.core_type<tc>} {
    %c0_i32 = arith.constant 0 : i32
    %c16_i32 = arith.constant 16 : i32
    %0 = arith.addi %c0_i32, %c16_i32 : i32
    %c1_i32 = arith.constant 1 : i32
    scf.for %arg12 = %c0_i32 to %0 step %c1_i32  : i32 {
      %c1_i32_21 = arith.constant 1 : i32
      %26 = arith.muli %arg12, %c1_i32_21 : i32
      %c0_i32_22 = arith.constant 0 : i32
      %27 = arith.addi %c0_i32_22, %26 : i32
      %28 = arith.index_cast %27 : i32 to index
      %29 = memref.load %arg0[%28] : memref<16xi32, #tpu.memory_space<smem>>
      %c0_i32_23 = arith.constant 0 : i32
      %30 = tpu.memref_slice %arg1[%29, %c0_i32_23] : memref<50x32xf32, #tpu.memory_space<any>> -> memref<1x32xf32, #tpu.memory_space<any>>
      %c0_i32_24 = arith.constant 0 : i32
      %31 = tpu.memref_slice %arg8[%27, %c0_i32_24] : memref<16x32xf32, #tpu.memory_space<vmem>> -> memref<1x32xf32, #tpu.memory_space<vmem>>
      %32 = tpu.memref_slice %arg11[%27] : memref<16x!tpu.dma_semaphore, #tpu.memory_space<semaphore_mem>> -> memref<1x!tpu.dma_semaphore, #tpu.memory_space<semaphore_mem>>
      %33 = tpu.memref_squeeze %32 : memref<1x!tpu.dma_semaphore, #tpu.memory_space<semaphore_mem>> -> memref<!tpu.dma_semaphore, #tpu.memory_space<semaphore_mem>>
      tpu.enqueue_dma source(%30 : memref<1x32xf32, #tpu.memory_space<any>>) target(%31 : memref<1x32xf32, #tpu.memory_space<vmem>>) target_semaphore(%33 : memref<!tpu.dma_semaphore, #tpu.memory_space<semaphore_mem>>)
    }
    %c16_i32_0 = arith.constant 16 : i32
    %c0 = arith.constant 0 : index
    %c0_1 = arith.constant 0 : index
    %1 = vector.load %arg2[%c0, %c0_1] : memref<32x128xf32, #tpu.memory_space<vmem>>, vector<32x128xf32>
    %c0_2 = arith.constant 0 : index
    %c0_3 = arith.constant 0 : index
    %2 = vector.load %arg3[%c0_2, %c0_3] : memref<32x128xf32, #tpu.memory_space<vmem>>, vector<32x128xf32>
    %c0_4 = arith.constant 0 : index
    %c0_5 = arith.constant 0 : index
    %3 = vector.load %arg4[%c0_4, %c0_5] : memref<1x128xf32, #tpu.memory_space<vmem>>, vector<1x128xf32>
    %cst = arith.constant 0.000000e+00 : f32
    %4 = vector.broadcast %cst : f32 to vector<1x32xf32>
    %cst_6 = arith.constant 0.000000e+00 : f32
    %5 = vector.broadcast %cst_6 : f32 to vector<1x32xf32>
    %c0_i32_7 = arith.constant 0 : i32
    %c2_i32 = arith.constant 2 : i32
    %6 = arith.addi %c0_i32_7, %c2_i32 : i32
    %c1_i32_8 = arith.constant 1 : i32
    %7:2 = scf.for %arg12 = %c0_i32_7 to %6 step %c1_i32_8 iter_args(%arg13 = %4, %arg14 = %5) -> (vector<1x32xf32>, vector<1x32xf32>)  : i32 {
      %c8_i32 = arith.constant 8 : i32
      %26 = arith.muli %arg12, %c8_i32 : i32
      %27 = tpu.assume_multiple %26, 8 : i32
      %c0_i32_21 = arith.constant 0 : i32
      %28 = arith.addi %27, %c0_i32_21 : i32
      %c0_i32_22 = arith.constant 0 : i32
      %29 = arith.addi %27, %c0_i32_22 : i32
      %c0_i32_23 = arith.constant 0 : i32
      %c0_i32_24 = arith.constant 0 : i32
      %30 = tpu.memref_slice %arg1[%c0_i32_23, %c0_i32_24] : memref<50x32xf32, #tpu.memory_space<any>> -> memref<1x32xf32, #tpu.memory_space<any>>
      %c0_i32_25 = arith.constant 0 : i32
      %31 = tpu.memref_slice %arg8[%28, %c0_i32_25] : memref<16x32xf32, #tpu.memory_space<vmem>> -> memref<1x32xf32, #tpu.memory_space<vmem>>
      %32 = tpu.memref_slice %arg11[%29] : memref<16x!tpu.dma_semaphore, #tpu.memory_space<semaphore_mem>> -> memref<1x!tpu.dma_semaphore, #tpu.memory_space<semaphore_mem>>
      %33 = tpu.memref_squeeze %32 : memref<1x!tpu.dma_semaphore, #tpu.memory_space<semaphore_mem>> -> memref<!tpu.dma_semaphore, #tpu.memory_space<semaphore_mem>>
      tpu.wait_dma2 semaphore(%33 : memref<!tpu.dma_semaphore, #tpu.memory_space<semaphore_mem>>) src(%30 : memref<1x32xf32, #tpu.memory_space<any>>) dst(%31 : memref<1x32xf32, #tpu.memory_space<vmem>>)
      %c1_i32_26 = arith.constant 1 : i32
      %34 = arith.addi %27, %c1_i32_26 : i32
      %c1_i32_27 = arith.constant 1 : i32
      %35 = arith.addi %27, %c1_i32_27 : i32
      %c0_i32_28 = arith.constant 0 : i32
      %c0_i32_29 = arith.constant 0 : i32
      %36 = tpu.memref_slice %arg1[%c0_i32_28, %c0_i32_29] : memref<50x32xf32, #tpu.memory_space<any>> -> memref<1x32xf32, #tpu.memory_space<any>>
      %c0_i32_30 = arith.constant 0 : i32
      %37 = tpu.memref_slice %arg8[%34, %c0_i32_30] : memref<16x32xf32, #tpu.memory_space<vmem>> -> memref<1x32xf32, #tpu.memory_space<vmem>>
      %38 = tpu.memref_slice %arg11[%35] : memref<16x!tpu.dma_semaphore, #tpu.memory_space<semaphore_mem>> -> memref<1x!tpu.dma_semaphore, #tpu.memory_space<semaphore_mem>>
      %39 = tpu.memref_squeeze %38 : memref<1x!tpu.dma_semaphore, #tpu.memory_space<semaphore_mem>> -> memref<!tpu.dma_semaphore, #tpu.memory_space<semaphore_mem>>
      tpu.wait_dma2 semaphore(%39 : memref<!tpu.dma_semaphore, #tpu.memory_space<semaphore_mem>>) src(%36 : memref<1x32xf32, #tpu.memory_space<any>>) dst(%37 : memref<1x32xf32, #tpu.memory_space<vmem>>)
      %c2_i32_31 = arith.constant 2 : i32
      %40 = arith.addi %27, %c2_i32_31 : i32
      %c2_i32_32 = arith.constant 2 : i32
      %41 = arith.addi %27, %c2_i32_32 : i32
      %c0_i32_33 = arith.constant 0 : i32
      %c0_i32_34 = arith.constant 0 : i32
      %42 = tpu.memref_slice %arg1[%c0_i32_33, %c0_i32_34] : memref<50x32xf32, #tpu.memory_space<any>> -> memref<1x32xf32, #tpu.memory_space<any>>
      %c0_i32_35 = arith.constant 0 : i32
      %43 = tpu.memref_slice %arg8[%40, %c0_i32_35] : memref<16x32xf32, #tpu.memory_space<vmem>> -> memref<1x32xf32, #tpu.memory_space<vmem>>
      %44 = tpu.memref_slice %arg11[%41] : memref<16x!tpu.dma_semaphore, #tpu.memory_space<semaphore_mem>> -> memref<1x!tpu.dma_semaphore, #tpu.memory_space<semaphore_mem>>
      %45 = tpu.memref_squeeze %44 : memref<1x!tpu.dma_semaphore, #tpu.memory_space<semaphore_mem>> -> memref<!tpu.dma_semaphore, #tpu.memory_space<semaphore_mem>>
      tpu.wait_dma2 semaphore(%45 : memref<!tpu.dma_semaphore, #tpu.memory_space<semaphore_mem>>) src(%42 : memref<1x32xf32, #tpu.memory_space<any>>) dst(%43 : memref<1x32xf32, #tpu.memory_space<vmem>>)
      %c3_i32 = arith.constant 3 : i32
      %46 = arith.addi %27, %c3_i32 : i32
      %c3_i32_36 = arith.constant 3 : i32
      %47 = arith.addi %27, %c3_i32_36 : i32
      %c0_i32_37 = arith.constant 0 : i32
      %c0_i32_38 = arith.constant 0 : i32
      %48 = tpu.memref_slice %arg1[%c0_i32_37, %c0_i32_38] : memref<50x32xf32, #tpu.memory_space<any>> -> memref<1x32xf32, #tpu.memory_space<any>>
      %c0_i32_39 = arith.constant 0 : i32
      %49 = tpu.memref_slice %arg8[%46, %c0_i32_39] : memref<16x32xf32, #tpu.memory_space<vmem>> -> memref<1x32xf32, #tpu.memory_space<vmem>>
      %50 = tpu.memref_slice %arg11[%47] : memref<16x!tpu.dma_semaphore, #tpu.memory_space<semaphore_mem>> -> memref<1x!tpu.dma_semaphore, #tpu.memory_space<semaphore_mem>>
      %51 = tpu.memref_squeeze %50 : memref<1x!tpu.dma_semaphore, #tpu.memory_space<semaphore_mem>> -> memref<!tpu.dma_semaphore, #tpu.memory_space<semaphore_mem>>
      tpu.wait_dma2 semaphore(%51 : memref<!tpu.dma_semaphore, #tpu.memory_space<semaphore_mem>>) src(%48 : memref<1x32xf32, #tpu.memory_space<any>>) dst(%49 : memref<1x32xf32, #tpu.memory_space<vmem>>)
      %c4_i32 = arith.constant 4 : i32
      %52 = arith.addi %27, %c4_i32 : i32
      %c4_i32_40 = arith.constant 4 : i32
      %53 = arith.addi %27, %c4_i32_40 : i32
      %c0_i32_41 = arith.constant 0 : i32
      %c0_i32_42 = arith.constant 0 : i32
      %54 = tpu.memref_slice %arg1[%c0_i32_41, %c0_i32_42] : memref<50x32xf32, #tpu.memory_space<any>> -> memref<1x32xf32, #tpu.memory_space<any>>
      %c0_i32_43 = arith.constant 0 : i32
      %55 = tpu.memref_slice %arg8[%52, %c0_i32_43] : memref<16x32xf32, #tpu.memory_space<vmem>> -> memref<1x32xf32, #tpu.memory_space<vmem>>
      %56 = tpu.memref_slice %arg11[%53] : memref<16x!tpu.dma_semaphore, #tpu.memory_space<semaphore_mem>> -> memref<1x!tpu.dma_semaphore, #tpu.memory_space<semaphore_mem>>
      %57 = tpu.memref_squeeze %56 : memref<1x!tpu.dma_semaphore, #tpu.memory_space<semaphore_mem>> -> memref<!tpu.dma_semaphore, #tpu.memory_space<semaphore_mem>>
      tpu.wait_dma2 semaphore(%57 : memref<!tpu.dma_semaphore, #tpu.memory_space<semaphore_mem>>) src(%54 : memref<1x32xf32, #tpu.memory_space<any>>) dst(%55 : memref<1x32xf32, #tpu.memory_space<vmem>>)
      %c5_i32 = arith.constant 5 : i32
      %58 = arith.addi %27, %c5_i32 : i32
      %c5_i32_44 = arith.constant 5 : i32
      %59 = arith.addi %27, %c5_i32_44 : i32
      %c0_i32_45 = arith.constant 0 : i32
      %c0_i32_46 = arith.constant 0 : i32
      %60 = tpu.memref_slice %arg1[%c0_i32_45, %c0_i32_46] : memref<50x32xf32, #tpu.memory_space<any>> -> memref<1x32xf32, #tpu.memory_space<any>>
      %c0_i32_47 = arith.constant 0 : i32
      %61 = tpu.memref_slice %arg8[%58, %c0_i32_47] : memref<16x32xf32, #tpu.memory_space<vmem>> -> memref<1x32xf32, #tpu.memory_space<vmem>>
      %62 = tpu.memref_slice %arg11[%59] : memref<16x!tpu.dma_semaphore, #tpu.memory_space<semaphore_mem>> -> memref<1x!tpu.dma_semaphore, #tpu.memory_space<semaphore_mem>>
      %63 = tpu.memref_squeeze %62 : memref<1x!tpu.dma_semaphore, #tpu.memory_space<semaphore_mem>> -> memref<!tpu.dma_semaphore, #tpu.memory_space<semaphore_mem>>
      tpu.wait_dma2 semaphore(%63 : memref<!tpu.dma_semaphore, #tpu.memory_space<semaphore_mem>>) src(%60 : memref<1x32xf32, #tpu.memory_space<any>>) dst(%61 : memref<1x32xf32, #tpu.memory_space<vmem>>)
      %c6_i32 = arith.constant 6 : i32
      %64 = arith.addi %27, %c6_i32 : i32
      %c6_i32_48 = arith.constant 6 : i32
      %65 = arith.addi %27, %c6_i32_48 : i32
      %c0_i32_49 = arith.constant 0 : i32
      %c0_i32_50 = arith.constant 0 : i32
      %66 = tpu.memref_slice %arg1[%c0_i32_49, %c0_i32_50] : memref<50x32xf32, #tpu.memory_space<any>> -> memref<1x32xf32, #tpu.memory_space<any>>
      %c0_i32_51 = arith.constant 0 : i32
      %67 = tpu.memref_slice %arg8[%64, %c0_i32_51] : memref<16x32xf32, #tpu.memory_space<vmem>> -> memref<1x32xf32, #tpu.memory_space<vmem>>
      %68 = tpu.memref_slice %arg11[%65] : memref<16x!tpu.dma_semaphore, #tpu.memory_space<semaphore_mem>> -> memref<1x!tpu.dma_semaphore, #tpu.memory_space<semaphore_mem>>
      %69 = tpu.memref_squeeze %68 : memref<1x!tpu.dma_semaphore, #tpu.memory_space<semaphore_mem>> -> memref<!tpu.dma_semaphore, #tpu.memory_space<semaphore_mem>>
      tpu.wait_dma2 semaphore(%69 : memref<!tpu.dma_semaphore, #tpu.memory_space<semaphore_mem>>) src(%66 : memref<1x32xf32, #tpu.memory_space<any>>) dst(%67 : memref<1x32xf32, #tpu.memory_space<vmem>>)
      %c7_i32 = arith.constant 7 : i32
      %70 = arith.addi %27, %c7_i32 : i32
      %c7_i32_52 = arith.constant 7 : i32
      %71 = arith.addi %27, %c7_i32_52 : i32
      %c0_i32_53 = arith.constant 0 : i32
      %c0_i32_54 = arith.constant 0 : i32
      %72 = tpu.memref_slice %arg1[%c0_i32_53, %c0_i32_54] : memref<50x32xf32, #tpu.memory_space<any>> -> memref<1x32xf32, #tpu.memory_space<any>>
      %c0_i32_55 = arith.constant 0 : i32
      %73 = tpu.memref_slice %arg8[%70, %c0_i32_55] : memref<16x32xf32, #tpu.memory_space<vmem>> -> memref<1x32xf32, #tpu.memory_space<vmem>>
      %74 = tpu.memref_slice %arg11[%71] : memref<16x!tpu.dma_semaphore, #tpu.memory_space<semaphore_mem>> -> memref<1x!tpu.dma_semaphore, #tpu.memory_space<semaphore_mem>>
      %75 = tpu.memref_squeeze %74 : memref<1x!tpu.dma_semaphore, #tpu.memory_space<semaphore_mem>> -> memref<!tpu.dma_semaphore, #tpu.memory_space<semaphore_mem>>
      tpu.wait_dma2 semaphore(%75 : memref<!tpu.dma_semaphore, #tpu.memory_space<semaphore_mem>>) src(%72 : memref<1x32xf32, #tpu.memory_space<any>>) dst(%73 : memref<1x32xf32, #tpu.memory_space<vmem>>)
      %76 = arith.index_cast %27 : i32 to index
      %c0_56 = arith.constant 0 : index
      %77 = vector.load %arg8[%76, %c0_56] : memref<16x32xf32, #tpu.memory_space<vmem>>, vector<8x32xf32>
      %cst_57 = arith.constant dense<0.000000e+00> : vector<8x128xf32>
      %78 = tpu.matmul %77, %1, %cst_57 {dimension_numbers = #tpu.dot_dimension_numbers<[1], [0], [0], [1], [0, 0, 1, 1], [], []>} : vector<8x32xf32>, vector<32x128xf32>, vector<8x128xf32> -> vector<8x128xf32>
      %79 = vector.broadcast %3 : vector<1x128xf32> to vector<8x128xf32>
      %80 = arith.addf %78, %79 : vector<8x128xf32>
      %c0_58 = arith.constant 0 : index
      %c0_59 = arith.constant 0 : index
      %81 = vector.load %arg9[%c0_58, %c0_59] : memref<8x128xf32, #tpu.memory_space<vmem>>, vector<8x128xf32>
      tpu.vector_store %arg9[%c0_58, %c0_59], %80 {strides = array<i32>} : memref<8x128xf32, #tpu.memory_space<vmem>>, vector<8x128xf32>,
      %c0_60 = arith.constant 0 : index
      %c0_61 = arith.constant 0 : index
      %82 = vector.load %arg9[%c0_60, %c0_61] : memref<8x128xf32, #tpu.memory_space<vmem>>, vector<1x128xf32>
      %cst_62 = arith.constant dense<0.000000e+00> : vector<1x128xf32>
      %83 = tpu.matmul %arg13, %2, %cst_62 {dimension_numbers = #tpu.dot_dimension_numbers<[1], [0], [0], [1], [0, 0, 1, 1], [], []>} : vector<1x32xf32>, vector<32x128xf32>, vector<1x128xf32> -> vector<1x128xf32>
      %84 = arith.addf %82, %83 : vector<1x128xf32>
      %85 = vector.extract_strided_slice %84 {offsets = [0, 0], sizes = [1, 96], strides = [1, 1]} : vector<1x128xf32> to vector<1x96xf32>
      %86 = arith.negf %85 : vector<1x96xf32>
      %87 = math.exp %86 : vector<1x96xf32>
      %cst_63 = arith.constant 1.000000e+00 : f32
      %88 = vector.broadcast %cst_63 : f32 to vector<1x96xf32>
      %89 = arith.addf %88, %87 : vector<1x96xf32>
      %90 = arith.divf %88, %89 : vector<1x96xf32>
      %91 = vector.extract_strided_slice %84 {offsets = [0, 96], sizes = [1, 32], strides = [1, 1]} : vector<1x128xf32> to vector<1x32xf32>
      %92 = math.tanh %91 : vector<1x32xf32>
      %93 = vector.extract_strided_slice %90 {offsets = [0, 0], sizes = [1, 32], strides = [1, 1]} : vector<1x96xf32> to vector<1x32xf32>
      %94 = vector.extract_strided_slice %90 {offsets = [0, 32], sizes = [1, 32], strides = [1, 1]} : vector<1x96xf32> to vector<1x32xf32>
      %95 = vector.extract_strided_slice %90 {offsets = [0, 64], sizes = [1, 32], strides = [1, 1]} : vector<1x96xf32> to vector<1x32xf32>
      %96 = arith.mulf %94, %arg14 : vector<1x32xf32>
      %97 = arith.mulf %93, %92 : vector<1x32xf32>
      %98 = arith.addf %96, %97 : vector<1x32xf32>
      %99 = math.tanh %98 : vector<1x32xf32>
      %100 = arith.mulf %95, %99 : vector<1x32xf32>
      %c1 = arith.constant 1 : index
      %c0_64 = arith.constant 0 : index
      %101 = vector.load %arg9[%c1, %c0_64] : memref<8x128xf32, #tpu.memory_space<vmem>>, vector<1x128xf32>
      %cst_65 = arith.constant dense<0.000000e+00> : vector<1x128xf32>
      %102 = tpu.matmul %100, %2, %cst_65 {dimension_numbers = #tpu.dot_dimension_numbers<[1], [0], [0], [1], [0, 0, 1, 1], [], []>} : vector<1x32xf32>, vector<32x128xf32>, vector<1x128xf32> -> vector<1x128xf32>
      %103 = arith.addf %101, %102 : vector<1x128xf32>
      %104 = vector.extract_strided_slice %103 {offsets = [0, 0], sizes = [1, 96], strides = [1, 1]} : vector<1x128xf32> to vector<1x96xf32>
      %105 = arith.negf %104 : vector<1x96xf32>
      %106 = math.exp %105 : vector<1x96xf32>
      %cst_66 = arith.constant 1.000000e+00 : f32
      %107 = vector.broadcast %cst_66 : f32 to vector<1x96xf32>
      %108 = arith.addf %107, %106 : vector<1x96xf32>
      %109 = arith.divf %107, %108 : vector<1x96xf32>
      %110 = vector.extract_strided_slice %103 {offsets = [0, 96], sizes = [1, 32], strides = [1, 1]} : vector<1x128xf32> to vector<1x32xf32>
      %111 = math.tanh %110 : vector<1x32xf32>
      %112 = vector.extract_strided_slice %109 {offsets = [0, 0], sizes = [1, 32], strides = [1, 1]} : vector<1x96xf32> to vector<1x32xf32>
      %113 = vector.extract_strided_slice %109 {offsets = [0, 32], sizes = [1, 32], strides = [1, 1]} : vector<1x96xf32> to vector<1x32xf32>
      %114 = vector.extract_strided_slice %109 {offsets = [0, 64], sizes = [1, 32], strides = [1, 1]} : vector<1x96xf32> to vector<1x32xf32>
      %115 = arith.mulf %113, %98 : vector<1x32xf32>
      %116 = arith.mulf %112, %111 : vector<1x32xf32>
      %117 = arith.addf %115, %116 : vector<1x32xf32>
      %118 = math.tanh %117 : vector<1x32xf32>
      %119 = arith.mulf %114, %118 : vector<1x32xf32>
      %c2 = arith.constant 2 : index
      %c0_67 = arith.constant 0 : index
      %120 = vector.load %arg9[%c2, %c0_67] : memref<8x128xf32, #tpu.memory_space<vmem>>, vector<1x128xf32>
      %cst_68 = arith.constant dense<0.000000e+00> : vector<1x128xf32>
      %121 = tpu.matmul %119, %2, %cst_68 {dimension_numbers = #tpu.dot_dimension_numbers<[1], [0], [0], [1], [0, 0, 1, 1], [], []>} : vector<1x32xf32>, vector<32x128xf32>, vector<1x128xf32> -> vector<1x128xf32>
      %122 = arith.addf %120, %121 : vector<1x128xf32>
      %123 = vector.extract_strided_slice %122 {offsets = [0, 0], sizes = [1, 96], strides = [1, 1]} : vector<1x128xf32> to vector<1x96xf32>
      %124 = arith.negf %123 : vector<1x96xf32>
      %125 = math.exp %124 : vector<1x96xf32>
      %cst_69 = arith.constant 1.000000e+00 : f32
      %126 = vector.broadcast %cst_69 : f32 to vector<1x96xf32>
      %127 = arith.addf %126, %125 : vector<1x96xf32>
      %128 = arith.divf %126, %127 : vector<1x96xf32>
      %129 = vector.extract_strided_slice %122 {offsets = [0, 96], sizes = [1, 32], strides = [1, 1]} : vector<1x128xf32> to vector<1x32xf32>
      %130 = math.tanh %129 : vector<1x32xf32>
      %131 = vector.extract_strided_slice %128 {offsets = [0, 0], sizes = [1, 32], strides = [1, 1]} : vector<1x96xf32> to vector<1x32xf32>
      %132 = vector.extract_strided_slice %128 {offsets = [0, 32], sizes = [1, 32], strides = [1, 1]} : vector<1x96xf32> to vector<1x32xf32>
      %133 = vector.extract_strided_slice %128 {offsets = [0, 64], sizes = [1, 32], strides = [1, 1]} : vector<1x96xf32> to vector<1x32xf32>
      %134 = arith.mulf %132, %117 : vector<1x32xf32>
      %135 = arith.mulf %131, %130 : vector<1x32xf32>
      %136 = arith.addf %134, %135 : vector<1x32xf32>
      %137 = math.tanh %136 : vector<1x32xf32>
      %138 = arith.mulf %133, %137 : vector<1x32xf32>
      %c3 = arith.constant 3 : index
      %c0_70 = arith.constant 0 : index
      %139 = vector.load %arg9[%c3, %c0_70] : memref<8x128xf32, #tpu.memory_space<vmem>>, vector<1x128xf32>
      %cst_71 = arith.constant dense<0.000000e+00> : vector<1x128xf32>
      %140 = tpu.matmul %138, %2, %cst_71 {dimension_numbers = #tpu.dot_dimension_numbers<[1], [0], [0], [1], [0, 0, 1, 1], [], []>} : vector<1x32xf32>, vector<32x128xf32>, vector<1x128xf32> -> vector<1x128xf32>
      %141 = arith.addf %139, %140 : vector<1x128xf32>
      %142 = vector.extract_strided_slice %141 {offsets = [0, 0], sizes = [1, 96], strides = [1, 1]} : vector<1x128xf32> to vector<1x96xf32>
      %143 = arith.negf %142 : vector<1x96xf32>
      %144 = math.exp %143 : vector<1x96xf32>
      %cst_72 = arith.constant 1.000000e+00 : f32
      %145 = vector.broadcast %cst_72 : f32 to vector<1x96xf32>
      %146 = arith.addf %145, %144 : vector<1x96xf32>
      %147 = arith.divf %145, %146 : vector<1x96xf32>
      %148 = vector.extract_strided_slice %141 {offsets = [0, 96], sizes = [1, 32], strides = [1, 1]} : vector<1x128xf32> to vector<1x32xf32>
      %149 = math.tanh %148 : vector<1x32xf32>
      %150 = vector.extract_strided_slice %147 {offsets = [0, 0], sizes = [1, 32], strides = [1, 1]} : vector<1x96xf32> to vector<1x32xf32>
      %151 = vector.extract_strided_slice %147 {offsets = [0, 32], sizes = [1, 32], strides = [1, 1]} : vector<1x96xf32> to vector<1x32xf32>
      %152 = vector.extract_strided_slice %147 {offsets = [0, 64], sizes = [1, 32], strides = [1, 1]} : vector<1x96xf32> to vector<1x32xf32>
      %153 = arith.mulf %151, %136 : vector<1x32xf32>
      %154 = arith.mulf %150, %149 : vector<1x32xf32>
      %155 = arith.addf %153, %154 : vector<1x32xf32>
      %156 = math.tanh %155 : vector<1x32xf32>
      %157 = arith.mulf %152, %156 : vector<1x32xf32>
      %c4 = arith.constant 4 : index
      %c0_73 = arith.constant 0 : index
      %158 = vector.load %arg9[%c4, %c0_73] : memref<8x128xf32, #tpu.memory_space<vmem>>, vector<1x128xf32>
      %cst_74 = arith.constant dense<0.000000e+00> : vector<1x128xf32>
      %159 = tpu.matmul %157, %2, %cst_74 {dimension_numbers = #tpu.dot_dimension_numbers<[1], [0], [0], [1], [0, 0, 1, 1], [], []>} : vector<1x32xf32>, vector<32x128xf32>, vector<1x128xf32> -> vector<1x128xf32>
      %160 = arith.addf %158, %159 : vector<1x128xf32>
      %161 = vector.extract_strided_slice %160 {offsets = [0, 0], sizes = [1, 96], strides = [1, 1]} : vector<1x128xf32> to vector<1x96xf32>
      %162 = arith.negf %161 : vector<1x96xf32>
      %163 = math.exp %162 : vector<1x96xf32>
      %cst_75 = arith.constant 1.000000e+00 : f32
      %164 = vector.broadcast %cst_75 : f32 to vector<1x96xf32>
      %165 = arith.addf %164, %163 : vector<1x96xf32>
      %166 = arith.divf %164, %165 : vector<1x96xf32>
      %167 = vector.extract_strided_slice %160 {offsets = [0, 96], sizes = [1, 32], strides = [1, 1]} : vector<1x128xf32> to vector<1x32xf32>
      %168 = math.tanh %167 : vector<1x32xf32>
      %169 = vector.extract_strided_slice %166 {offsets = [0, 0], sizes = [1, 32], strides = [1, 1]} : vector<1x96xf32> to vector<1x32xf32>
      %170 = vector.extract_strided_slice %166 {offsets = [0, 32], sizes = [1, 32], strides = [1, 1]} : vector<1x96xf32> to vector<1x32xf32>
      %171 = vector.extract_strided_slice %166 {offsets = [0, 64], sizes = [1, 32], strides = [1, 1]} : vector<1x96xf32> to vector<1x32xf32>
      %172 = arith.mulf %170, %155 : vector<1x32xf32>
      %173 = arith.mulf %169, %168 : vector<1x32xf32>
      %174 = arith.addf %172, %173 : vector<1x32xf32>
      %175 = math.tanh %174 : vector<1x32xf32>
      %176 = arith.mulf %171, %175 : vector<1x32xf32>
      %c5 = arith.constant 5 : index
      %c0_76 = arith.constant 0 : index
      %177 = vector.load %arg9[%c5, %c0_76] : memref<8x128xf32, #tpu.memory_space<vmem>>, vector<1x128xf32>
      %cst_77 = arith.constant dense<0.000000e+00> : vector<1x128xf32>
      %178 = tpu.matmul %176, %2, %cst_77 {dimension_numbers = #tpu.dot_dimension_numbers<[1], [0], [0], [1], [0, 0, 1, 1], [], []>} : vector<1x32xf32>, vector<32x128xf32>, vector<1x128xf32> -> vector<1x128xf32>
      %179 = arith.addf %177, %178 : vector<1x128xf32>
      %180 = vector.extract_strided_slice %179 {offsets = [0, 0], sizes = [1, 96], strides = [1, 1]} : vector<1x128xf32> to vector<1x96xf32>
      %181 = arith.negf %180 : vector<1x96xf32>
      %182 = math.exp %181 : vector<1x96xf32>
      %cst_78 = arith.constant 1.000000e+00 : f32
      %183 = vector.broadcast %cst_78 : f32 to vector<1x96xf32>
      %184 = arith.addf %183, %182 : vector<1x96xf32>
      %185 = arith.divf %183, %184 : vector<1x96xf32>
      %186 = vector.extract_strided_slice %179 {offsets = [0, 96], sizes = [1, 32], strides = [1, 1]} : vector<1x128xf32> to vector<1x32xf32>
      %187 = math.tanh %186 : vector<1x32xf32>
      %188 = vector.extract_strided_slice %185 {offsets = [0, 0], sizes = [1, 32], strides = [1, 1]} : vector<1x96xf32> to vector<1x32xf32>
      %189 = vector.extract_strided_slice %185 {offsets = [0, 32], sizes = [1, 32], strides = [1, 1]} : vector<1x96xf32> to vector<1x32xf32>
      %190 = vector.extract_strided_slice %185 {offsets = [0, 64], sizes = [1, 32], strides = [1, 1]} : vector<1x96xf32> to vector<1x32xf32>
      %191 = arith.mulf %189, %174 : vector<1x32xf32>
      %192 = arith.mulf %188, %187 : vector<1x32xf32>
      %193 = arith.addf %191, %192 : vector<1x32xf32>
      %194 = math.tanh %193 : vector<1x32xf32>
      %195 = arith.mulf %190, %194 : vector<1x32xf32>
      %c6 = arith.constant 6 : index
      %c0_79 = arith.constant 0 : index
      %196 = vector.load %arg9[%c6, %c0_79] : memref<8x128xf32, #tpu.memory_space<vmem>>, vector<1x128xf32>
      %cst_80 = arith.constant dense<0.000000e+00> : vector<1x128xf32>
      %197 = tpu.matmul %195, %2, %cst_80 {dimension_numbers = #tpu.dot_dimension_numbers<[1], [0], [0], [1], [0, 0, 1, 1], [], []>} : vector<1x32xf32>, vector<32x128xf32>, vector<1x128xf32> -> vector<1x128xf32>
      %198 = arith.addf %196, %197 : vector<1x128xf32>
      %199 = vector.extract_strided_slice %198 {offsets = [0, 0], sizes = [1, 96], strides = [1, 1]} : vector<1x128xf32> to vector<1x96xf32>
      %200 = arith.negf %199 : vector<1x96xf32>
      %201 = math.exp %200 : vector<1x96xf32>
      %cst_81 = arith.constant 1.000000e+00 : f32
      %202 = vector.broadcast %cst_81 : f32 to vector<1x96xf32>
      %203 = arith.addf %202, %201 : vector<1x96xf32>
      %204 = arith.divf %202, %203 : vector<1x96xf32>
      %205 = vector.extract_strided_slice %198 {offsets = [0, 96], sizes = [1, 32], strides = [1, 1]} : vector<1x128xf32> to vector<1x32xf32>
      %206 = math.tanh %205 : vector<1x32xf32>
      %207 = vector.extract_strided_slice %204 {offsets = [0, 0], sizes = [1, 32], strides = [1, 1]} : vector<1x96xf32> to vector<1x32xf32>
      %208 = vector.extract_strided_slice %204 {offsets = [0, 32], sizes = [1, 32], strides = [1, 1]} : vector<1x96xf32> to vector<1x32xf32>
      %209 = vector.extract_strided_slice %204 {offsets = [0, 64], sizes = [1, 32], strides = [1, 1]} : vector<1x96xf32> to vector<1x32xf32>
      %210 = arith.mulf %208, %193 : vector<1x32xf32>
      %211 = arith.mulf %207, %206 : vector<1x32xf32>
      %212 = arith.addf %210, %211 : vector<1x32xf32>
      %213 = math.tanh %212 : vector<1x32xf32>
      %214 = arith.mulf %209, %213 : vector<1x32xf32>
      %c7 = arith.constant 7 : index
      %c0_82 = arith.constant 0 : index
      %215 = vector.load %arg9[%c7, %c0_82] : memref<8x128xf32, #tpu.memory_space<vmem>>, vector<1x128xf32>
      %cst_83 = arith.constant dense<0.000000e+00> : vector<1x128xf32>
      %216 = tpu.matmul %214, %2, %cst_83 {dimension_numbers = #tpu.dot_dimension_numbers<[1], [0], [0], [1], [0, 0, 1, 1], [], []>} : vector<1x32xf32>, vector<32x128xf32>, vector<1x128xf32> -> vector<1x128xf32>
      %217 = arith.addf %215, %216 : vector<1x128xf32>
      %218 = vector.extract_strided_slice %217 {offsets = [0, 0], sizes = [1, 96], strides = [1, 1]} : vector<1x128xf32> to vector<1x96xf32>
      %219 = arith.negf %218 : vector<1x96xf32>
      %220 = math.exp %219 : vector<1x96xf32>
      %cst_84 = arith.constant 1.000000e+00 : f32
      %221 = vector.broadcast %cst_84 : f32 to vector<1x96xf32>
      %222 = arith.addf %221, %220 : vector<1x96xf32>
      %223 = arith.divf %221, %222 : vector<1x96xf32>
      %224 = vector.extract_strided_slice %217 {offsets = [0, 96], sizes = [1, 32], strides = [1, 1]} : vector<1x128xf32> to vector<1x32xf32>
      %225 = math.tanh %224 : vector<1x32xf32>
      %226 = vector.extract_strided_slice %223 {offsets = [0, 0], sizes = [1, 32], strides = [1, 1]} : vector<1x96xf32> to vector<1x32xf32>
      %227 = vector.extract_strided_slice %223 {offsets = [0, 32], sizes = [1, 32], strides = [1, 1]} : vector<1x96xf32> to vector<1x32xf32>
      %228 = vector.extract_strided_slice %223 {offsets = [0, 64], sizes = [1, 32], strides = [1, 1]} : vector<1x96xf32> to vector<1x32xf32>
      %229 = arith.mulf %227, %212 : vector<1x32xf32>
      %230 = arith.mulf %226, %225 : vector<1x32xf32>
      %231 = arith.addf %229, %230 : vector<1x32xf32>
      %232 = math.tanh %231 : vector<1x32xf32>
      %233 = arith.mulf %228, %232 : vector<1x32xf32>
      %234 = tpu.concatenate %100, %119, %138, %157, %176, %195, %214, %233 in 0 : vector<1x32xf32>, vector<1x32xf32>, vector<1x32xf32>, vector<1x32xf32>, vector<1x32xf32>, vector<1x32xf32>, vector<1x32xf32>, vector<1x32xf32> -> vector<8x32xf32>
      %235 = arith.index_cast %27 : i32 to index
      %c0_85 = arith.constant 0 : index
      %236 = vector.load %arg10[%235, %c0_85] : memref<16x32xf32, #tpu.memory_space<vmem>>, vector<8x32xf32>
      tpu.vector_store %arg10[%235, %c0_85], %234 {strides = array<i32>} : memref<16x32xf32, #tpu.memory_space<vmem>>, vector<8x32xf32>,
      scf.yield %233, %231 : vector<1x32xf32>, vector<1x32xf32>
    }
    %c2_i32_9 = arith.constant 2 : i32
    %c0_10 = arith.constant 0 : index
    %c0_11 = arith.constant 0 : index
    %8 = vector.load %arg10[%c0_10, %c0_11] : memref<16x32xf32, #tpu.memory_space<vmem>>, vector<16x32xf32>
    %c0_12 = arith.constant 0 : index
    %c0_13 = arith.constant 0 : index
    %9 = vector.load %arg5[%c0_12, %c0_13] : memref<32x128xf32, #tpu.memory_space<vmem>>, vector<32x128xf32>
    %cst_14 = arith.constant dense<0.000000e+00> : vector<16x128xf32>
    %10 = tpu.matmul %8, %9, %cst_14 {dimension_numbers = #tpu.dot_dimension_numbers<[1], [0], [0], [1], [0, 0, 1, 1], [], []>} : vector<16x32xf32>, vector<32x128xf32>, vector<16x128xf32> -> vector<16x128xf32>
    %c0_15 = arith.constant 0 : index
    %c0_16 = arith.constant 0 : index
    %11 = vector.load %arg6[%c0_15, %c0_16] : memref<1x128xf32, #tpu.memory_space<vmem>>, vector<1x128xf32>
    %12 = vector.broadcast %11 : vector<1x128xf32> to vector<16x128xf32>
    %13 = arith.addf %10, %12 : vector<16x128xf32>
    %cst_17 = arith.constant dense<0xFF800000> : vector<16xf32>
    %14 = vector.multi_reduction <maximumf>, %13, %cst_17 [1] : vector<16x128xf32> to vector<16xf32>
    %15 = vector.shape_cast %14 : vector<16xf32> to vector<16x1xf32>
    %16 = vector.broadcast %15 : vector<16x1xf32> to vector<16x128xf32>
    %17 = arith.subf %13, %16 : vector<16x128xf32>
    %18 = math.exp %17 : vector<16x128xf32>
    %cst_18 = arith.constant dense<0.000000e+00> : vector<16xf32>
    %19 = vector.multi_reduction <add>, %18, %cst_18 [1] : vector<16x128xf32> to vector<16xf32>
    %20 = vector.shape_cast %19 : vector<16xf32> to vector<16x1xf32>
    %21 = math.log %20 : vector<16x1xf32>
    %22 = arith.addf %15, %21 : vector<16x1xf32>
    %23 = vector.broadcast %22 : vector<16x1xf32> to vector<16x128xf32>
    %24 = arith.subf %13, %23 : vector<16x128xf32>
    %c0_19 = arith.constant 0 : index
    %c0_20 = arith.constant 0 : index
    %25 = vector.load %arg7[%c0_19, %c0_20] : memref<16x128xf32, #tpu.memory_space<vmem>>, vector<16x128xf32>
    tpu.vector_store %arg7[%c0_19, %c0_20], %24 {strides = array<i32>} : memref<16x128xf32, #tpu.memory_space<vmem>>, vector<16x128xf32>,
    return
  }
}

</mosaic_0001>

<bundles_post_ra>
// kernel: tpu_custom_call.1
= control target key start
LH: loop header
LB: loop body
LE: loop exit
PB: predicated region body
PF: predicated region fallthrough
CT: control target
= control target key end

     0   :  { %12 = vsyncpa [#allocation9], 0  ;;  %s1469_s0 = inlined_call_operand.vmem [shape: s32[16], index: 0, kind: input, shape index: {}]   ;;  %s1470_s1 = inlined_call_operand.vmem [shape: f32[50,32], index: 1, kind: input, shape index: {}]   ;;  %s1471_s2 = inlined_call_operand.vmem [shape: f32[32,128], index: 2, kind: input, shape index: {}]   ;;  %s1472_s3 = inlined_call_operand.vmem [shape: f32[32,128], index: 3, kind: input, shape index: {}]   ;;  %s1473_s4 = inlined_call_operand.vmem [shape: f32[1,128], index: 4, kind: input, shape index: {}]   ;;  %s1474_s5 = inlined_call_operand.hbm [shape: f32[32,128], index: 5, kind: input, shape index: {}]   ;;  %s1475_s6 = inlined_call_operand.vmem [shape: f32[1,128], index: 6, kind: input, shape index: {}]   ;;  %s1476_s7 = inlined_call_operand.hbm [shape: f32[16,128], index: 7, kind: output, shape index: {}]  }
   0x1   :  { %13 = vsyncpa [#allocation7], 0 }
   0x2   :  { %14 = vsyncpa [#allocation8], 0  ;;  %s20_s26 = sshll.u32 %s1469_s0, 4  ;;  %s34_s29 = sshll.u32 %s1474_s5, 4  ;;  %s21_s26 = int_to_ptr.vmem [resolvable:$true] %s20_s26  ;;  %s35_s29 = int_to_ptr.hbm [resolvable:$true] %s34_s29 }
   0x3   :  { %s1243_s30 = smov [#allocation6]   ;;  %s1244_s8 = smov [#allocation10]  }
   0x4   :  { %23 = dma.vmem_to_smem %s21_s26, 16, %s1243_s30, [#allocation9]  }
   0x5   :  { %s36_s9 = sshll.u32 %s1244_s8, 4  ;;  %s1245_s10 = smov 128   ;;  %s37_s9 = int_to_ptr.vmem [resolvable:$true] %s36_s9 }
   0x6   :  { %s1246_s11 = smov 8  }
   0x7   :  { %42 = dma.hbm_to_vmem [thread:$0]  %s35_s29, 512, %s37_s9, [#allocation7], %s1245_s10, %s1245_s10, %s1246_s11  }
   0x8   :  { %1205 = dma.done.wait [#allocation9], 16  }
   0x9   :  { %1206 = vsyncadd [#allocation9], 4294967280 }
   0xa   :  { %1207 = dma.done.wait [#allocation7], 512  }
   0xb   :  { %1208 = vsyncadd [#allocation7], 4294966784 }
   0xc   :  { %53 = sfence }
   0xd   :  { %s1227_s0 = smov 0  }
   0xe LB: > { %s60_s5 = sld [smem:[#allocation6 + %s1229_s0]]  ;;  %s62_s15 = scalar_lea.vmem [#allocation2], %s1229_s0  ;;  %s1229_s0 = sphi %s1227_s0, %s59_s0  }
   0xf   : > { %s63_s16 = scalar_lea.sflag [#allocation5], %s1229_s0 }
  0x14   : > { %s61_s14 = scalar_lea.vmem %s1470_s1, %s60_s5 }
  0x15   : > { %v78_v0 = vld [vmem:[%s61_s14] sm:$0x1] }
  0x16   : > { %79 = vst [vmem:[%s62_s15] sm:$0x1] %v78_v0 }
  0x17   : > { %97 = vsyncadd %s63_s16, 16  ;;  %s59_s0 = sadd.s32 1, %s1229_s0  }
  0x18   : > { %p56_p0 = scmp.ge.s32.totalorder %s59_s0, 16  }
  0x19   :  { %v1305_v1 = vld [vmem:[%s1471_s2] sm:$0xff] (%p56_p0)  ;;  %v1310_v2 = vld [vmem:[%s1471_s2 + $0x8] sm:$0xff] (%p56_p0)  ;;  %v1315_v3 = vld [vmem:[%s1471_s2 + $0x10] sm:$0xff] (%p56_p0)  ;;  %v1347_v10 = vmov (%p56_p0), 0.0   ;;  %v1349_v11 = vmov (%p56_p0), 0.0   ;;  %s1351_s0 = smov (%p56_p0), 0  }
  0x1a   :  { %58 = sbr.rel (!%p56_p0) target bundleno = 14 (0xe), region = 128  ;;  %v1320_v4 = vld [vmem:[%s1471_s2 + $0x18] sm:$0xff] (%p56_p0)  ;;  %v1325_v5 = vld [vmem:[%s1472_s3] sm:$0xff] (%p56_p0)  ;;  %v1330_v6 = vld [vmem:[%s1472_s3 + $0x8] sm:$0xff] (%p56_p0) }
  0x1b   :  { %v1335_v7 = vld [vmem:[%s1472_s3 + $0x10] sm:$0xff] (%p56_p0)  ;;  %v1340_v8 = vld [vmem:[%s1472_s3 + $0x18] sm:$0xff] (%p56_p0)  ;;  %v1345_v9 = vld [vmem:[%s1473_s4] sm:$0x1] (%p56_p0) }
  0x1f LB: > { %s1361_s3 = sshll.u32 %s1241_s0, 3  ;;  %s1241_s0 = sphi %s1351_s0, %s112_s0   ;;  %v1237_v11 = vphi %v1349_v11, %v689_v11   ;;  %v1233_v10 = vphi %v1347_v10, %v683_v10  }
  0x20   : > { %s116_s4 = scalar_lea.sflag [#allocation5], %s1361_s3 }
  0x21   : > { %1209 = dma.done.wait %s116_s4, 16 }
  0x22   : > { %1210 = vsyncadd %s116_s4, 4294967280  ;;  %s927_s5 = scalar_lea.sflag %s116_s4, 1 [#allocation5] }
  0x23   : > { %1211 = dma.done.wait %s927_s5, 16 }
  0x24   : > { %1212 = vsyncadd %s927_s5, 4294967280  ;;  %s930_s12 = scalar_lea.sflag %s116_s4, 2 [#allocation5] }
  0x25   : > { %1213 = dma.done.wait %s930_s12, 16 }
  0x26   : > { %1214 = vsyncadd %s930_s12, 4294967280  ;;  %s933_s13 = scalar_lea.sflag %s116_s4, 3 [#allocation5] }
  0x27   : > { %1215 = dma.done.wait %s933_s13, 16 }
  0x28   : > { %1216 = vsyncadd %s933_s13, 4294967280  ;;  %s936_s14 = scalar_lea.sflag %s116_s4, 4 [#allocation5] }
  0x29   : > { %1217 = dma.done.wait %s936_s14, 16 }
  0x2a   : > { %1218 = vsyncadd %s936_s14, 4294967280  ;;  %s939_s15 = scalar_lea.sflag %s116_s4, 5 [#allocation5] }
  0x2b   : > { %1219 = dma.done.wait %s939_s15, 16 }
  0x2c   : > { %1220 = vsyncadd %s939_s15, 4294967280  ;;  %s942_s16 = scalar_lea.sflag %s116_s4, 6 [#allocation5] }
  0x2d   : > { %1221 = dma.done.wait %s942_s16, 16 }
  0x2e   : > { %1222 = vsyncadd %s942_s16, 4294967280  ;;  %s945_s17 = scalar_lea.sflag %s116_s4, 7 [#allocation5] }
  0x2f   : > { %1223 = dma.done.wait %s945_s17, 16 }
  0x30   : > { %1224 = vsyncadd %s945_s17, 4294967280  ;;  %169 = vmatpush.msra.mxu0 %v1320_v4  ;;  %196 = vmatpush.msra.mxu1 %v1340_v8  ;;  %s1247_s18 = smov 64   ;;  %vm153_vm0 = vcmask 261120   ;;  %s148_s19 = scalar_lea.vmem [#allocation2], %s1361_s3  ;;  %v151_v14 = vperm.slane %v1345_v9, 0  ;;  %vm705_vm13 = vcmask 1040384  }
  0x31   : > { %180 = vrot.lane.b32.xlu0 %v1237_v11, %s1247_s18  ;;  %260 = vmatpush.msra.mxu2 %v1340_v8  ;;  %v149_v12 = vld [vmem:[%s148_s19] sm:$0xff]  ;;  %s1248_s20 = smov 32   ;;  %vm707_vm14 = vcmask 1041408   ;;  %s723_s21 = scalar_lea.vmem [#allocation4], %s1361_s3 }
  0x32   : > { %170 = vmatpush.msra.mxu0 %v1315_v3  ;;  %197 = vmatpush.msra.mxu1 %v1335_v7  ;;  %s112_s0 = sadd.s32 1, %s1241_s0  }
  0x33   : > { %261 = vmatpush.msra.mxu2 %v1335_v7  ;;  %324 = vmatpush.msra.mxu3 %v1340_v8  ;;  %p109_p1 = scmp.ge.s32.totalorder %s112_s0, 2  }
  0x34   : > { %171 = vmatpush.msra.mxu0 %v1310_v2  ;;  %198 = vmatpush.msra.mxu1 %v1330_v6  ;;  %s795_s26 = sshll.u32 (%p109_p1), %s1476_s7, 4  ;;  %s796_s26 = int_to_ptr.hbm [resolvable:$true] %s795_s26 }
  0x35   : > { %262 = vmatpush.msra.mxu2 %v1330_v6  ;;  %325 = vmatpush.msra.mxu3 %v1335_v7 }
  0x36   : > { %172 = vmatpush.msra.mxu0 %v1305_v1  ;;  %199 = vmatpush.msra.mxu1 %v1325_v5  ;;  %v1120_v1 = vld [vmem:[%s1475_s6] ss:$0 sm:$0xff] (%p109_p1)  ;;  %s1249_s6 = smov (%p109_p1), [#allocation11]  }
  0x37   : > { %263 = vmatpush.msra.mxu2 %v1325_v5  ;;  %326 = vmatpush.msra.mxu3 %v1330_v6  ;;  %s793_s24 = sshll.u32 (%p109_p1), %s1249_s6, 4  ;;  %s794_s24 = int_to_ptr.vmem [resolvable:$true] %s793_s24 }
  0x38   : > { %978 = vmatmul.msk.f32.vlgmr.msra.gmra.mxu0 %vm153_vm0, %v149_v12  ;;  %452 = vmatpush.msrb.mxu1 %v1340_v8 }
  0x39   : > { %327 = vmatpush.msra.mxu3 %v1325_v5  ;;  %388 = vmatpush.msrb.mxu0 %v1340_v8 }
  0x3a   : > { %453 = vmatpush.msrb.mxu1 %v1335_v7  ;;  %516 = vmatpush.msrb.mxu2 %v1340_v8 }
  0x3b   : > { %389 = vmatpush.msrb.mxu0 %v1335_v7  ;;  %580 = vmatpush.msrb.mxu3 %v1340_v8 }
  0x3c   : > { %454 = vmatpush.msrb.mxu1 %v1330_v6  ;;  %517 = vmatpush.msrb.mxu2 %v1335_v7 }
  0x3d   : > { %390 = vmatpush.msrb.mxu0 %v1330_v6  ;;  %581 = vmatpush.msrb.mxu3 %v1335_v7 }
  0x3e   : > { %455 = vmatpush.msrb.mxu1 %v1325_v5  ;;  %518 = vmatpush.msrb.mxu2 %v1330_v6 }
  0x3f   : > { %391 = vmatpush.msrb.mxu0 %v1325_v5  ;;  %582 = vmatpush.msrb.mxu3 %v1330_v6 }
  0x40   : > { %519 = vmatpush.msrb.mxu2 %v1325_v5 }
  0x41   : > { %644 = vmatpush.msra.mxu0 %v1340_v8  ;;  %583 = vmatpush.msrb.mxu3 %v1325_v5 }
  0x43   : > { %645 = vmatpush.msra.mxu0 %v1335_v7 }
  0x45   : > { %646 = vmatpush.msra.mxu0 %v1330_v6 }
  0x47   : > { %647 = vmatpush.msra.mxu0 %v1325_v5 }
  0xa3   : > { %v181_v13 = vpop.permute.xlu0 %180 }
  0xa4   : > { %979 = vmatmul.msk.f32.vlgmr.msra.gmra.mxu1 %vm153_vm0, %v181_v13 }
  0xb5   : > { %v174_v15 = vpop.f32.mrf.mxu0 }
  0xb6   : > { %v175_v16 = vadd.f32 %v174_v15, %v151_v14 }
  0xb8   : > { %177 = vst [vmem:[#allocation3] sm:$0xff] %v175_v16 }
  0xbf   : > { %v178_v17 = vld [vmem:[#allocation3] sm:$0x1]  ;;  %v242_v43 = vld [vmem:[#allocation3 + $0x1] sm:$0x1]  ;;  %v306_v14 = vld [vmem:[#allocation3 + $0x2] sm:$0x1] }
 0x121   : > { %v201_v18 = vpop.f32.mrf.mxu1 }
 0x122   : > { %v204_v19 = vadd.f32 %v201_v18, %v178_v17 }
 0x124   : > { %1056 = vtanh.f32 %v204_v19  ;;  %v980_v21 = vmul.f32 -1.442695, %v204_v19 }
 0x126   : > { %1058 = vpow2.f32 %v980_v21 }
 0x12a   : > { %v1057_v20 = vpop.eup %1056 }
 0x12b   : > { %227 = vrot.lane.b32.xlu0 %v1057_v20, %s1248_s20 }
 0x12c   : > { %v1059_v22 = vpop.eup %1058 }
 0x12d   : > { %v208_v23 = vadd.f32 1.0, %v1059_v22 }
 0x12f   : > { %1060 = vrcp.f32 %v208_v23  ;;  %v220_v29 = vand.u32 2147483648, %v208_v23  ;;  %vm214_vm2 = vweird.f32 %v208_v23  ;;  %v218_v30 = vand.u32 2147483647, %v208_v23 }
 0x131   : > { %v221_v32 = vor.u32 1.1754944e-38, %v220_v29  ;;  %vm219_vm4 = vcmp.eq.f32.partialorder %v218_v30, 8.507059e+37 }
 0x135   : > { %v1061_v24 = vpop.eup %1060 }
 0x136   : > { %v210_v25 = vmul.f32 %v1061_v24, %v208_v23  ;;  %vm215_vm1 = vweird.f32 %v1061_v24 }
 0x137   : > { %vm216_vm3 = vmor %vm214_vm2, %vm215_vm1 }
 0x138   : > { %v211_v26 = vsub.f32 1.0, %v210_v25 }
 0x13a   : > { %v212_v27 = vmul.f32 %v1061_v24, %v211_v26 }
 0x13c   : > { %v213_v28 = vadd.f32 %v1061_v24, %v212_v27 }
 0x13e   : > { %v217_v31 = vsel %vm216_vm3, %v1061_v24, %v213_v28 }
 0x13f   : > { %v222_v34 = vsel %vm219_vm4, %v221_v32, %v217_v31  ;;  %vm709_vm4 = vcmask 1042432  }
 0x140   : > { %v225_v36 = vmul.f32 %v1233_v10, %v222_v34 }
 0x19d   : > { %v228_v33 = vpop.permute.xlu0 %227 }
 0x19e   : > { %v230_v35 = vmul.f32 %v228_v33, %v222_v34 }
 0x1a0   : > { %232 = vrot.lane.b32.xlu1 %v230_v35, %s1248_s20 }
 0x212   : > { %v233_v37 = vpop.permute.xlu1 %232 }
 0x213   : > { %v235_v38 = vadd.f32 %v233_v37, %v225_v36 }
 0x215   : > { %1062 = vtanh.f32 %v235_v38 }
 0x21b   : > { %v1063_v39 = vpop.eup %1062 }
 0x21c   : > { %238 = vrot.lane.b32.xlu1 %v1063_v39, %s1248_s20 }
 0x28e   : > { %v239_v40 = vpop.permute.xlu1 %238 }
 0x28f   : > { %v1409_v41 = vmul.f32 %v239_v40, %v222_v34 }
 0x291   : > { %244 = vrot.lane.b32.xlu2 %v1409_v41, %s1247_s18 }
 0x2eb   : > { %v245_v42 = vpop.permute.xlu2 %244 }
 0x2ec   : > { %981 = vmatmul.msk.f32.vlgmr.msra.gmra.mxu2 %vm153_vm0, %v245_v42 }
 0x36f   : > { %v265_v44 = vpop.f32.mrf.mxu2 }
 0x370   : > { %v268_v45 = vadd.f32 %v265_v44, %v242_v43 }
 0x372   : > { %1064 = vtanh.f32 %v268_v45  ;;  %v982_v47 = vmul.f32 -1.442695, %v268_v45  ;;  %v370_v45 = vld [vmem:[#allocation3 + $0x3] sm:$0x1] }
 0x374   : > { %1066 = vpow2.f32 %v982_v47 }
 0x378   : > { %v1065_v46 = vpop.eup %1064 }
 0x379   : > { %291 = vrot.lane.b32.xlu2 %v1065_v46, %s1248_s20 }
 0x37a   : > { %v1067_v48 = vpop.eup %1066 }
 0x37b   : > { %v272_v49 = vadd.f32 1.0, %v1067_v48 }
 0x37d   : > { %1068 = vrcp.f32 %v272_v49  ;;  %v284_v55 = vand.u32 2147483648, %v272_v49  ;;  %vm278_vm6 = vweird.f32 %v272_v49  ;;  %v282_v56 = vand.u32 2147483647, %v272_v49 }
 0x37f   : > { %v285_v58 = vor.u32 1.1754944e-38, %v284_v55  ;;  %vm283_vm8 = vcmp.eq.f32.partialorder %v282_v56, 8.507059e+37 }
 0x383   : > { %v1069_v50 = vpop.eup %1068 }
 0x384   : > { %v274_v51 = vmul.f32 %v1069_v50, %v272_v49  ;;  %vm279_vm5 = vweird.f32 %v1069_v50 }
 0x385   : > { %vm280_vm7 = vmor %vm278_vm6, %vm279_vm5 }
 0x386   : > { %v275_v52 = vsub.f32 1.0, %v274_v51 }
 0x388   : > { %v276_v53 = vmul.f32 %v1069_v50, %v275_v52 }
 0x38a   : > { %v277_v54 = vadd.f32 %v1069_v50, %v276_v53 }
 0x38c   : > { %v281_v57 = vsel %vm280_vm7, %v1069_v50, %v277_v54 }
 0x38d   : > { %v286_v60 = vsel %vm283_vm8, %v285_v58, %v281_v57 }
 0x38e   : > { %v289_v62 = vmul.f32 %v286_v60, %v235_v38 }
 0x3d3   : > { %v292_v59 = vpop.permute.xlu2 %291 }
 0x3d4   : > { %v294_v61 = vmul.f32 %v292_v59, %v286_v60 }
 0x3d6   : > { %296 = vrot.lane.b32.xlu0 %v294_v61, %s1248_s20 }
 0x448   : > { %v297_v63 = vpop.permute.xlu0 %296 }
 0x449   : > { %v299_v0 = vadd.f32 %v297_v63, %v289_v62 }
 0x44b   : > { %1070 = vtanh.f32 %v299_v0 }
 0x451   : > { %v1071_v10 = vpop.eup %1070 }
 0x452   : > { %302 = vrot.lane.b32.xlu1 %v1071_v10, %s1248_s20 }
 0x4c4   : > { %v303_v11 = vpop.permute.xlu1 %302 }
 0x4c5   : > { %v305_v12 = vmul.f32 %v303_v11, %v286_v60 }
 0x4c7   : > { %308 = vrot.lane.b32.xlu2 %v305_v12, %s1247_s18  ;;  %v690_v37 = vrot.slane %v305_v12, 7 }
 0x4c9   : > { %v706_v42 = vsel %vm705_vm13, %v1409_v41, %v690_v37 }
 0x521   : > { %v309_v13 = vpop.permute.xlu2 %308 }
 0x522   : > { %983 = vmatmul.msk.f32.vlgmr.msra.gmra.mxu3 %vm153_vm0, %v309_v13 }
 0x5a5   : > { %v329_v15 = vpop.f32.mrf.mxu3 }
 0x5a6   : > { %v332_v16 = vadd.f32 %v329_v15, %v306_v14 }
 0x5a8   : > { %1072 = vtanh.f32 %v332_v16  ;;  %v984_v18 = vmul.f32 -1.442695, %v332_v16 }
 0x5aa   : > { %1074 = vpow2.f32 %v984_v18 }
 0x5ae   : > { %v1073_v17 = vpop.eup %1072 }
 0x5af   : > { %355 = vrot.lane.b32.xlu0 %v1073_v17, %s1248_s20  ;;  %v434_v17 = vld [vmem:[#allocation3 + $0x4] sm:$0x1] }
 0x5b0   : > { %v1075_v19 = vpop.eup %1074 }
 0x5b1   : > { %v336_v20 = vadd.f32 1.0, %v1075_v19 }
 0x5b3   : > { %1076 = vrcp.f32 %v336_v20  ;;  %v348_v26 = vand.u32 2147483648, %v336_v20  ;;  %vm342_vm10 = vweird.f32 %v336_v20  ;;  %v346_v27 = vand.u32 2147483647, %v336_v20 }
 0x5b5   : > { %v349_v29 = vor.u32 1.1754944e-38, %v348_v26  ;;  %vm347_vm12 = vcmp.eq.f32.partialorder %v346_v27, 8.507059e+37 }
 0x5b9   : > { %v1077_v21 = vpop.eup %1076 }
 0x5ba   : > { %v338_v22 = vmul.f32 %v1077_v21, %v336_v20  ;;  %vm343_vm9 = vweird.f32 %v1077_v21 }
 0x5bb   : > { %vm344_vm11 = vmor %vm342_vm10, %vm343_vm9  ;;  %vm711_vm9 = vcmask 1043456  }
 0x5bc   : > { %v339_v23 = vsub.f32 1.0, %v338_v22 }
 0x5be   : > { %v340_v24 = vmul.f32 %v1077_v21, %v339_v23 }
 0x5c0   : > { %v341_v25 = vadd.f32 %v1077_v21, %v340_v24 }
 0x5c2   : > { %v345_v28 = vsel %vm344_vm11, %v1077_v21, %v341_v25 }
 0x5c3   : > { %v350_v31 = vsel %vm347_vm12, %v349_v29, %v345_v28 }
 0x5c4   : > { %v353_v33 = vmul.f32 %v350_v31, %v299_v0 }
 0x621   : > { %v356_v30 = vpop.permute.xlu0 %355 }
 0x622   : > { %v358_v32 = vmul.f32 %v356_v30, %v350_v31 }
 0x624   : > { %360 = vrot.lane.b32.xlu1 %v358_v32, %s1248_s20 }
 0x696   : > { %v361_v34 = vpop.permute.xlu1 %360 }
 0x697   : > { %v363_v35 = vadd.f32 %v361_v34, %v353_v33 }
 0x699   : > { %1078 = vtanh.f32 %v363_v35 }
 0x69f   : > { %v1079_v36 = vpop.eup %1078 }
 0x6a0   : > { %366 = vrot.lane.b32.xlu2 %v1079_v36, %s1248_s20 }
 0x6fa   : > { %v367_v38 = vpop.permute.xlu2 %366 }
 0x6fb   : > { %v369_v39 = vmul.f32 %v367_v38, %v350_v31 }
 0x6fd   : > { %v692_v40 = vrot.slane %v369_v39, 6  ;;  %372 = vrot.lane.b32.xlu0 %v369_v39, %s1247_s18 }
 0x6ff   : > { %v708_v43 = vsel %vm707_vm14, %v706_v42, %v692_v40  ;;  %vm713_vm14 = vcmask 1044480  }
 0x76f   : > { %v373_v44 = vpop.permute.xlu0 %372 }
 0x770   : > { %985 = vmatmul.msk.f32.vlgmr.msrb.gmra.mxu0 %vm153_vm0, %v373_v44 }
 0x7ed   : > { %v393_v46 = vpop.f32.mrf.mxu0 }
 0x7ee   : > { %v396_v47 = vadd.f32 %v393_v46, %v370_v45  ;;  %v498_v46 = vld [vmem:[#allocation3 + $0x5] sm:$0x1] }
 0x7f0   : > { %1080 = vtanh.f32 %v396_v47  ;;  %v986_v49 = vmul.f32 -1.442695, %v396_v47 }
 0x7f2   : > { %1082 = vpow2.f32 %v986_v49 }
 0x7f6   : > { %v1081_v48 = vpop.eup %1080 }
 0x7f7   : > { %419 = vrot.lane.b32.xlu1 %v1081_v48, %s1248_s20 }
 0x7f8   : > { %v1083_v50 = vpop.eup %1082 }
 0x7f9   : > { %v400_v51 = vadd.f32 1.0, %v1083_v50 }
 0x7fb   : > { %1084 = vrcp.f32 %v400_v51  ;;  %v412_v56 = vand.u32 2147483648, %v400_v51  ;;  %vm406_vm1 = vweird.f32 %v400_v51  ;;  %v410_v57 = vand.u32 2147483647, %v400_v51 }
 0x7fd   : > { %v413_v59 = vor.u32 1.1754944e-38, %v412_v56  ;;  %vm411_vm3 = vcmp.eq.f32.partialorder %v410_v57, 8.507059e+37 }
 0x801   : > { %v1085_v52 = vpop.eup %1084 }
 0x802   : > { %v402_v53 = vmul.f32 %v1085_v52, %v400_v51  ;;  %vm407_vm15 = vweird.f32 %v1085_v52 }
 0x803   : > { %vm408_vm2 = vmor %vm406_vm1, %vm407_vm15 }
 0x804   : > { %v403_v54 = vsub.f32 1.0, %v402_v53 }
 0x806   : > { %v404_v41 = vmul.f32 %v1085_v52, %v403_v54 }
 0x808   : > { %v405_v55 = vadd.f32 %v1085_v52, %v404_v41 }
 0x80a   : > { %v409_v58 = vsel %vm408_vm2, %v1085_v52, %v405_v55 }
 0x80b   : > { %v414_v61 = vsel %vm411_vm3, %v413_v59, %v409_v58 }
 0x80c   : > { %v417_v63 = vmul.f32 %v414_v61, %v363_v35 }
 0x869   : > { %v420_v60 = vpop.permute.xlu1 %419 }
 0x86a   : > { %v422_v62 = vmul.f32 %v420_v60, %v414_v61 }
 0x86c   : > { %424 = vrot.lane.b32.xlu2 %v422_v62, %s1248_s20 }
 0x8c6   : > { %v425_v0 = vpop.permute.xlu2 %424 }
 0x8c7   : > { %v427_v10 = vadd.f32 %v425_v0, %v417_v63 }
 0x8c9   : > { %1086 = vtanh.f32 %v427_v10 }
 0x8cf   : > { %v1087_v11 = vpop.eup %1086 }
 0x8d0   : > { %430 = vrot.lane.b32.xlu0 %v1087_v11, %s1248_s20 }
 0x942   : > { %v431_v12 = vpop.permute.xlu0 %430 }
 0x943   : > { %v433_v13 = vmul.f32 %v431_v12, %v414_v61 }
 0x945   : > { %v694_v14 = vrot.slane %v433_v13, 5  ;;  %436 = vrot.lane.b32.xlu1 %v433_v13, %s1247_s18 }
 0x947   : > { %v710_v15 = vsel %vm709_vm4, %v708_v43, %v694_v14  ;;  %vm715_vm4 = vcmask 1045504  }
 0x9b7   : > { %v437_v16 = vpop.permute.xlu1 %436 }
 0x9b8   : > { %987 = vmatmul.msk.f32.vlgmr.msrb.gmra.mxu1 %vm153_vm0, %v437_v16 }
 0xa35   : > { %v457_v18 = vpop.f32.mrf.mxu1 }
 0xa36   : > { %v460_v19 = vadd.f32 %v457_v18, %v434_v17  ;;  %v562_v18 = vld [vmem:[#allocation3 + $0x6] sm:$0x1] }
 0xa38   : > { %1088 = vtanh.f32 %v460_v19  ;;  %v988_v21 = vmul.f32 -1.442695, %v460_v19 }
 0xa3a   : > { %1090 = vpow2.f32 %v988_v21 }
 0xa3e   : > { %v1089_v20 = vpop.eup %1088 }
 0xa3f   : > { %483 = vrot.lane.b32.xlu2 %v1089_v20, %s1248_s20 }
 0xa40   : > { %v1091_v22 = vpop.eup %1090 }
 0xa41   : > { %v464_v23 = vadd.f32 1.0, %v1091_v22 }
 0xa43   : > { %1092 = vrcp.f32 %v464_v23  ;;  %v476_v29 = vand.u32 2147483648, %v464_v23  ;;  %vm470_vm6 = vweird.f32 %v464_v23  ;;  %v474_v30 = vand.u32 2147483647, %v464_v23 }
 0xa45   : > { %v477_v32 = vor.u32 1.1754944e-38, %v476_v29  ;;  %vm475_vm8 = vcmp.eq.f32.partialorder %v474_v30, 8.507059e+37 }
 0xa49   : > { %v1093_v24 = vpop.eup %1092 }
 0xa4a   : > { %v466_v25 = vmul.f32 %v1093_v24, %v464_v23  ;;  %vm471_vm5 = vweird.f32 %v1093_v24 }
 0xa4b   : > { %vm472_vm7 = vmor %vm470_vm6, %vm471_vm5 }
 0xa4c   : > { %v467_v26 = vsub.f32 1.0, %v466_v25 }
 0xa4e   : > { %v468_v27 = vmul.f32 %v1093_v24, %v467_v26 }
 0xa50   : > { %v469_v28 = vadd.f32 %v1093_v24, %v468_v27 }
 0xa52   : > { %v473_v31 = vsel %vm472_vm7, %v1093_v24, %v469_v28 }
 0xa53   : > { %v478_v34 = vsel %vm475_vm8, %v477_v32, %v473_v31 }
 0xa54   : > { %v481_v36 = vmul.f32 %v478_v34, %v427_v10 }
 0xa99   : > { %v484_v33 = vpop.permute.xlu2 %483 }
 0xa9a   : > { %v486_v35 = vmul.f32 %v484_v33, %v478_v34 }
 0xa9c   : > { %488 = vrot.lane.b32.xlu0 %v486_v35, %s1248_s20 }
 0xb0e   : > { %v489_v37 = vpop.permute.xlu0 %488 }
 0xb0f   : > { %v491_v38 = vadd.f32 %v489_v37, %v481_v36 }
 0xb11   : > { %1094 = vtanh.f32 %v491_v38 }
 0xb17   : > { %v1095_v39 = vpop.eup %1094 }
 0xb18   : > { %494 = vrot.lane.b32.xlu1 %v1095_v39, %s1248_s20 }
 0xb8a   : > { %v495_v40 = vpop.permute.xlu1 %494 }
 0xb8b   : > { %v497_v42 = vmul.f32 %v495_v40, %v478_v34 }
 0xb8d   : > { %v696_v43 = vrot.slane %v497_v42, 4  ;;  %500 = vrot.lane.b32.xlu2 %v497_v42, %s1247_s18 }
 0xb8f   : > { %v712_v44 = vsel %vm711_vm9, %v710_v15, %v696_v43  ;;  %vm717_vm9 = vcmask 1046528  }
 0xbe7   : > { %v501_v45 = vpop.permute.xlu2 %500 }
 0xbe8   : > { %989 = vmatmul.msk.f32.vlgmr.msrb.gmra.mxu2 %vm153_vm0, %v501_v45 }
 0xc6b   : > { %v521_v47 = vpop.f32.mrf.mxu2 }
 0xc6c   : > { %v524_v48 = vadd.f32 %v521_v47, %v498_v46  ;;  %v626_v47 = vld [vmem:[#allocation3 + $0x7] sm:$0x1] }
 0xc6e   : > { %1096 = vtanh.f32 %v524_v48  ;;  %v990_v50 = vmul.f32 -1.442695, %v524_v48 }
 0xc70   : > { %1098 = vpow2.f32 %v990_v50 }
 0xc74   : > { %v1097_v49 = vpop.eup %1096 }
 0xc75   : > { %547 = vrot.lane.b32.xlu0 %v1097_v49, %s1248_s20 }
 0xc76   : > { %v1099_v51 = vpop.eup %1098 }
 0xc77   : > { %v528_v52 = vadd.f32 1.0, %v1099_v51 }
 0xc79   : > { %1100 = vrcp.f32 %v528_v52  ;;  %v540_v57 = vand.u32 2147483648, %v528_v52  ;;  %vm534_vm11 = vweird.f32 %v528_v52  ;;  %v538_v58 = vand.u32 2147483647, %v528_v52 }
 0xc7b   : > { %v541_v60 = vor.u32 1.1754944e-38, %v540_v57  ;;  %vm539_vm13 = vcmp.eq.f32.partialorder %v538_v58, 8.507059e+37 }
 0xc7f   : > { %v1101_v53 = vpop.eup %1100 }
 0xc80   : > { %v530_v54 = vmul.f32 %v1101_v53, %v528_v52  ;;  %vm535_vm10 = vweird.f32 %v1101_v53 }
 0xc81   : > { %vm536_vm12 = vmor %vm534_vm11, %vm535_vm10 }
 0xc82   : > { %v531_v41 = vsub.f32 1.0, %v530_v54 }
 0xc84   : > { %v532_v55 = vmul.f32 %v1101_v53, %v531_v41 }
 0xc86   : > { %v533_v56 = vadd.f32 %v1101_v53, %v532_v55 }
 0xc88   : > { %v537_v59 = vsel %vm536_vm12, %v1101_v53, %v533_v56 }
 0xc89   : > { %v542_v62 = vsel %vm539_vm13, %v541_v60, %v537_v59 }
 0xc8a   : > { %v545_v0 = vmul.f32 %v542_v62, %v491_v38 }
 0xce7   : > { %v548_v61 = vpop.permute.xlu0 %547 }
 0xce8   : > { %v550_v63 = vmul.f32 %v548_v61, %v542_v62 }
 0xcea   : > { %552 = vrot.lane.b32.xlu1 %v550_v63, %s1248_s20 }
 0xd5c   : > { %v553_v10 = vpop.permute.xlu1 %552 }
 0xd5d   : > { %v555_v11 = vadd.f32 %v553_v10, %v545_v0 }
 0xd5f   : > { %1102 = vtanh.f32 %v555_v11 }
 0xd65   : > { %v1103_v12 = vpop.eup %1102 }
 0xd66   : > { %558 = vrot.lane.b32.xlu2 %v1103_v12, %s1248_s20 }
 0xdc0   : > { %v559_v13 = vpop.permute.xlu2 %558 }
 0xdc1   : > { %v561_v14 = vmul.f32 %v559_v13, %v542_v62 }
 0xdc3   : > { %v698_v15 = vrot.slane %v561_v14, 3  ;;  %564 = vrot.lane.b32.xlu0 %v561_v14, %s1247_s18 }
 0xdc5   : > { %v714_v16 = vsel %vm713_vm14, %v712_v44, %v698_v15 }
 0xe35   : > { %v565_v17 = vpop.permute.xlu0 %564 }
 0xe36   : > { %991 = vmatmul.msk.f32.vlgmr.msrb.gmra.mxu3 %vm153_vm0, %v565_v17  ;;  %v730_v17 = vld [vmem:[#allocation10 + $0x18] sm:$0xff] (%p109_p1) }
 0xe37   :  { %1013 = vmatpush.msra.mxu1 (%p109_p1), %v730_v17 }
 0xeb9   : > { %v585_v19 = vpop.f32.mrf.mxu3 }
 0xeba   : > { %v588_v20 = vadd.f32 %v585_v19, %v562_v18  ;;  %v729_v18 = vld [vmem:[#allocation10 + $0x10] sm:$0xff] (%p109_p1)  ;;  %v728_v19 = vld [vmem:[#allocation10 + $0x8] sm:$0xff] (%p109_p1) }
 0xebb   :  { %1014 = vmatpush.msra.mxu1 (%p109_p1), %v729_v18 }
 0xebc   : > { %1104 = vtanh.f32 %v588_v20  ;;  %v992_v22 = vmul.f32 -1.442695, %v588_v20  ;;  %v727_v20 = vld [vmem:[#allocation10] sm:$0xff] (%p109_p1) }
 0xebd   :  { %1015 = vmatpush.msra.mxu1 (%p109_p1), %v728_v19 }
 0xebe   : > { %1106 = vpow2.f32 %v992_v22 }
 0xebf   :  { %1016 = vmatpush.msra.mxu1 (%p109_p1), %v727_v20 }
 0xec2   : > { %v1105_v21 = vpop.eup %1104 }
 0xec3   : > { %611 = vrot.lane.b32.xlu1 %v1105_v21, %s1248_s20 }
 0xec4   : > { %v1107_v23 = vpop.eup %1106 }
 0xec5   : > { %v592_v24 = vadd.f32 1.0, %v1107_v23 }
 0xec7   : > { %1108 = vrcp.f32 %v592_v24  ;;  %v604_v30 = vand.u32 2147483648, %v592_v24  ;;  %vm598_vm1 = vweird.f32 %v592_v24  ;;  %v602_v31 = vand.u32 2147483647, %v592_v24 }
 0xec9   : > { %v605_v33 = vor.u32 1.1754944e-38, %v604_v30  ;;  %vm603_vm3 = vcmp.eq.f32.partialorder %v602_v31, 8.507059e+37 }
 0xecd   : > { %v1109_v25 = vpop.eup %1108 }
 0xece   : > { %v594_v26 = vmul.f32 %v1109_v25, %v592_v24  ;;  %vm599_vm15 = vweird.f32 %v1109_v25 }
 0xecf   : > { %vm600_vm2 = vmor %vm598_vm1, %vm599_vm15 }
 0xed0   : > { %v595_v27 = vsub.f32 1.0, %v594_v26 }
 0xed2   : > { %v596_v28 = vmul.f32 %v1109_v25, %v595_v27 }
 0xed4   : > { %v597_v29 = vadd.f32 %v1109_v25, %v596_v28 }
 0xed6   : > { %v601_v32 = vsel %vm600_vm2, %v1109_v25, %v597_v29 }
 0xed7   : > { %v606_v35 = vsel %vm603_vm3, %v605_v33, %v601_v32 }
 0xed8   : > { %v609_v37 = vmul.f32 %v606_v35, %v555_v11 }
 0xf35   : > { %v612_v34 = vpop.permute.xlu1 %611 }
 0xf36   : > { %v614_v36 = vmul.f32 %v612_v34, %v606_v35 }
 0xf38   : > { %616 = vrot.lane.b32.xlu2 %v614_v36, %s1248_s20 }
 0xf92   : > { %v617_v38 = vpop.permute.xlu2 %616 }
 0xf93   : > { %v619_v39 = vadd.f32 %v617_v38, %v609_v37 }
 0xf95   : > { %1110 = vtanh.f32 %v619_v39 }
 0xf9b   : > { %v1111_v40 = vpop.eup %1110 }
 0xf9c   : > { %622 = vrot.lane.b32.xlu0 %v1111_v40, %s1248_s20 }
0x100e   : > { %v623_v42 = vpop.permute.xlu0 %622 }
0x100f   : > { %v625_v43 = vmul.f32 %v623_v42, %v606_v35 }
0x1011   : > { %v700_v44 = vrot.slane %v625_v43, 2  ;;  %628 = vrot.lane.b32.xlu1 %v625_v43, %s1247_s18 }
0x1013   : > { %v716_v45 = vsel %vm715_vm4, %v714_v16, %v700_v44 }
0x1083   : > { %v629_v46 = vpop.permute.xlu1 %628 }
0x1084   : > { %993 = vmatmul.msk.f32.vlgmr.msra.gmra.mxu0 %vm153_vm0, %v629_v46 }
0x1085   :  { %754 = vmatpush.msra.mxu0 (%p109_p1), %v730_v17 }
0x1087   :  { %755 = vmatpush.msra.mxu0 (%p109_p1), %v729_v18 }
0x1089   :  { %756 = vmatpush.msra.mxu0 (%p109_p1), %v728_v19 }
0x108b   :  { %757 = vmatpush.msra.mxu0 (%p109_p1), %v727_v20 }
0x1101   : > { %v649_v48 = vpop.f32.mrf.mxu0 }
0x1102   : > { %v652_v49 = vadd.f32 %v649_v48, %v626_v47 }
0x1104   : > { %1112 = vtanh.f32 %v652_v49  ;;  %v994_v51 = vmul.f32 -1.442695, %v652_v49 }
0x1106   : > { %1114 = vpow2.f32 %v994_v51 }
0x110a   : > { %v1113_v50 = vpop.eup %1112 }
0x110b   : > { %675 = vrot.lane.b32.xlu2 %v1113_v50, %s1248_s20 }
0x110c   : > { %v1115_v52 = vpop.eup %1114 }
0x110d   : > { %v656_v53 = vadd.f32 1.0, %v1115_v52 }
0x110f   : > { %1116 = vrcp.f32 %v656_v53  ;;  %v668_v58 = vand.u32 2147483648, %v656_v53  ;;  %vm662_vm6 = vweird.f32 %v656_v53  ;;  %v666_v59 = vand.u32 2147483647, %v656_v53 }
0x1111   : > { %v669_v61 = vor.u32 1.1754944e-38, %v668_v58  ;;  %vm667_vm8 = vcmp.eq.f32.partialorder %v666_v59, 8.507059e+37 }
0x1115   : > { %v1117_v54 = vpop.eup %1116 }
0x1116   : > { %v658_v41 = vmul.f32 %v1117_v54, %v656_v53  ;;  %vm663_vm5 = vweird.f32 %v1117_v54 }
0x1117   : > { %vm664_vm7 = vmor %vm662_vm6, %vm663_vm5 }
0x1118   : > { %v659_v55 = vsub.f32 1.0, %v658_v41 }
0x111a   : > { %v660_v56 = vmul.f32 %v1117_v54, %v659_v55 }
0x111c   : > { %v661_v57 = vadd.f32 %v1117_v54, %v660_v56 }
0x111e   : > { %v665_v60 = vsel %vm664_vm7, %v1117_v54, %v661_v57 }
0x111f   : > { %v670_v63 = vsel %vm667_vm8, %v669_v61, %v665_v60 }
0x1120   : > { %v673_v10 = vmul.f32 %v670_v63, %v619_v39 }
0x1165   : > { %v676_v62 = vpop.permute.xlu2 %675 }
0x1166   : > { %v678_v0 = vmul.f32 %v676_v62, %v670_v63 }
0x1168   : > { %680 = vrot.lane.b32.xlu0 %v678_v0, %s1248_s20 }
0x11da   : > { %v681_v11 = vpop.permute.xlu0 %680 }
0x11db   : > { %v683_v10 = vadd.f32 %v681_v11, %v673_v10  }
0x11dd   : > { %1118 = vtanh.f32 %v683_v10 }
0x11e3   : > { %v1119_v12 = vpop.eup %1118 }
0x11e4   : > { %686 = vrot.lane.b32.xlu1 %v1119_v12, %s1248_s20 }
0x1256   : > { %v687_v13 = vpop.permute.xlu1 %686 }
0x1257   : > { %v689_v11 = vmul.f32 %v687_v13, %v670_v63  }
0x1259   : > { %v703_v14 = vrot.slane %v689_v11, 1 }
0x125b   : > { %v718_v15 = vsel %vm717_vm9, %v716_v45, %v703_v14 }
0x125c   : > { %720 = vrot.lane.b32.xlu2 %v718_v15, %s1247_s18 }
0x12b3   :  { %111 = sbr.rel (!%p109_p1) target bundleno = 31 (0x1f), region = 139 }
0x12b6   : > { %v721_v16 = vpop.permute.xlu2 %720 }
0x12b7   : > { %724 = vst.msk [vmem:[%s723_s21] sm:$0xff] %vm153_vm0, %v721_v16 }
0x12be   :  { %v725_v21 = vld [vmem:[#allocation4] sm:$0xff]  ;;  %v726_v22 = vld [vmem:[#allocation4 + $0x8] sm:$0xff] }
0x12bf   :  { %995 = vmatmul.msk.f32.vlgmr.msra.gmra.mxu0 %vm153_vm0, %v725_v21  ;;  %996 = vmatmul.msk.f32.vlgmr.msra.gmra.mxu1 %vm153_vm0, %v726_v22 }
0x133c   :  { %v759_v2 = vpop.f32.mrf.mxu0  ;;  %v762_v4 = vpop.f32.mrf.mxu1 }
0x133d   :  { %v760_v3 = vadd.f32 %v1120_v1, %v759_v2  ;;  %v763_v5 = vadd.f32 %v1120_v1, %v762_v4 }
0x133f   :  { %765 = vmax.xlane.f32.xlu0 %v760_v3 }
0x1347   :  { %767 = vmax.xlane.f32.xlu0 %v763_v5 }
0x13b2   :  { %v766_v6 = vpop.xlane.xlu0 %765 }
0x13b3   :  { %v769_v7 = vsub.f32 %v760_v3, %v766_v6 }
0x13b5   :  { %v771_v8 = vmul.f32 1.442695, %v769_v7 }
0x13b7   :  { %1121 = vpow2.f32 %v771_v8 }
0x13ba   :  { %v768_v9 = vpop.xlane.xlu0 %767 }
0x13bb   :  { %v770_v23 = vsub.f32 %v763_v5, %v768_v9 }
0x13bd   :  { %v1122_v24 = vpop.eup %1121  ;;  %v773_v25 = vmul.f32 1.442695, %v770_v23 }
0x13be   :  { %775 = vadd.xlane.f32.xlu1 %v1122_v24 }
0x13bf   :  { %1123 = vpow2.f32 %v773_v25 }
0x13c5   :  { %v1124_v26 = vpop.eup %1123 }
0x13c6   :  { %777 = vadd.xlane.f32.xlu1 %v1124_v26 }
0x1431   :  { %v776_v27 = vpop.xlane.xlu1 %775 }
0x1432   :  { %1125 = vlog2.f32 %v776_v27 }
0x1438   :  { %v1126_v28 = vpop.eup %1125 }
0x1439   :  { %v780_v29 = vmul.f32 0.6931472, %v1126_v28  ;;  %v778_v30 = vpop.xlane.xlu1 %777 }
0x143a   :  { %1127 = vlog2.f32 %v778_v30 }
0x143b   :  { %v783_v31 = vadd.f32 %v780_v29, %v766_v6 }
0x143d   :  { %v785_v32 = vsub.f32 %v760_v3, %v783_v31 }
0x143f   :  { %787 = vst [vmem:[#allocation11] sm:$0xff] %v785_v32 }
0x1440   :  { %v1128_v33 = vpop.eup %1127 }
0x1441   :  { %v782_v34 = vmul.f32 0.6931472, %v1128_v33 }
0x1443   :  { %v784_v35 = vadd.f32 %v782_v34, %v768_v9 }
0x1445   :  { %v786_v36 = vsub.f32 %v763_v5, %v784_v35 }
0x1447   :  { %788 = vst [vmem:[#allocation11 + $0x8] sm:$0xff] %v786_v36 }
0x1448   :  { %801 = dma.vmem_to_hbm [thread:$0]  %s794_s24, 256, %s796_s26, [#allocation8], %s1245_s10, %s1245_s10, %s1246_s11  }
0x1449   :  { %1225 = dma.done.wait [#allocation8], 256  }
0x144a   :  { %1226 = vsyncadd [#allocation8], 4294967040 }
0x144b   :  { %806 = vsyncpa [#allocation7], 1 }
0x144c   :  { %807 = vsyncpa [#allocation8], 1 }
0x144d   :  { %808 = vsyncpa [#allocation9], 1 }
0x144e   :  { %809 = vsyncmov [#allocation5] }
0x1451   :  { %s810_s27 = vpop.sfrf %809 }
0x1452   :  { %p997_p2 = scmp.ne.s32.totalorder %s810_s27, 0 }
0x1454   :  { %814 = shalt.err (%p997_p2)  }
0x1455   :  { %816 = vsyncmov [#allocation5 + $0x1] }
0x1458   :  { %s817_s7 = vpop.sfrf %816 }
0x1459   :  { %p998_p3 = scmp.ne.s32.totalorder %s817_s7, 0 }
0x145b   :  { %821 = shalt.err (%p998_p3)  }
0x145c   :  { %823 = vsyncmov [#allocation5 + $0x2] }
0x145f   :  { %s824_s28 = vpop.sfrf %823 }
0x1460   :  { %p999_p4 = scmp.ne.s32.totalorder %s824_s28, 0 }
0x1462   :  { %828 = shalt.err (%p999_p4)  }
0x1463   :  { %830 = vsyncmov [#allocation5 + $0x3] }
0x1466   :  { %s831_s29 = vpop.sfrf %830 }
0x1467   :  { %p1000_p5 = scmp.ne.s32.totalorder %s831_s29, 0 }
0x1469   :  { %835 = shalt.err (%p1000_p5)  }
0x146a   :  { %837 = vsyncmov [#allocation5 + $0x4] }
0x146d   :  { %s838_s10 = vpop.sfrf %837 }
0x146e   :  { %p1001_p6 = scmp.ne.s32.totalorder %s838_s10, 0 }
0x1470   :  { %842 = shalt.err (%p1001_p6)  }
0x1471   :  { %844 = vsyncmov [#allocation5 + $0x5] }
0x1474   :  { %s845_s11 = vpop.sfrf %844 }
0x1475   :  { %p1002_p7 = scmp.ne.s32.totalorder %s845_s11, 0 }
0x1477   :  { %849 = shalt.err (%p1002_p7)  }
0x1478   :  { %851 = vsyncmov [#allocation5 + $0x6] }
0x147b   :  { %s852_s30 = vpop.sfrf %851 }
0x147c   :  { %p1003_p8 = scmp.ne.s32.totalorder %s852_s30, 0 }
0x147e   :  { %856 = shalt.err (%p1003_p8)  }
0x147f   :  { %858 = vsyncmov [#allocation5 + $0x7] }
0x1482   :  { %s859_s8 = vpop.sfrf %858 }
0x1483   :  { %p1004_p9 = scmp.ne.s32.totalorder %s859_s8, 0 }
0x1485   :  { %863 = shalt.err (%p1004_p9)  }
0x1486   :  { %865 = vsyncmov [#allocation5 + $0x8] }
0x1489   :  { %s866_s2 = vpop.sfrf %865 }
0x148a   :  { %p1005_p10 = scmp.ne.s32.totalorder %s866_s2, 0 }
0x148c   :  { %870 = shalt.err (%p1005_p10)  }
0x148d   :  { %872 = vsyncmov [#allocation5 + $0x9] }
0x1490   :  { %s873_s9 = vpop.sfrf %872 }
0x1491   :  { %p1006_p11 = scmp.ne.s32.totalorder %s873_s9, 0 }
0x1493   :  { %877 = shalt.err (%p1006_p11)  }
0x1494   :  { %879 = vsyncmov [#allocation5 + $0xa] }
0x1497   :  { %s880_s0 = vpop.sfrf %879 }
0x1498   :  { %p1007_p12 = scmp.ne.s32.totalorder %s880_s0, 0 }
0x149a   :  { %884 = shalt.err (%p1007_p12)  }
0x149b   :  { %886 = vsyncmov [#allocation5 + $0xb] }
0x149e   :  { %s887_s3 = vpop.sfrf %886 }
0x149f   :  { %p1008_p13 = scmp.ne.s32.totalorder %s887_s3, 0 }
0x14a1   :  { %891 = shalt.err (%p1008_p13)  }
0x14a2   :  { %893 = vsyncmov [#allocation5 + $0xc] }
0x14a5   :  { %s894_s4 = vpop.sfrf %893 }
0x14a6   :  { %p1009_p0 = scmp.ne.s32.totalorder %s894_s4, 0 }
0x14a8   :  { %898 = shalt.err (%p1009_p0)  }
0x14a9   :  { %900 = vsyncmov [#allocation5 + $0xd] }
0x14ac   :  { %s901_s5 = vpop.sfrf %900 }
0x14ad   :  { %p1010_p1 = scmp.ne.s32.totalorder %s901_s5, 0 }
0x14af   :  { %905 = shalt.err (%p1010_p1)  }
0x14b0   :  { %907 = vsyncmov [#allocation5 + $0xe] }
0x14b3   :  { %s908_s12 = vpop.sfrf %907 }
0x14b4   :  { %p1011_p2 = scmp.ne.s32.totalorder %s908_s12, 0 }
0x14b6   :  { %912 = shalt.err (%p1011_p2)  }
0x14b7   :  { %914 = vsyncmov [#allocation5 + $0xf] }
0x14ba   :  { %s915_s13 = vpop.sfrf %914 }
0x14bb   :  { %p1012_p3 = scmp.ne.s32.totalorder %s915_s13, 0 }
0x14bd   :  { %919 = shalt.err (%p1012_p3)  }

</bundles_post_ra>
